<compile_context>
chip_gen: v7x
topology: tpu7x:2x2x1
jax: 0.10.0
libtpu: 0.0.40
codegen_flags: <defaults>
</compile_context>

<pallas_src>
import math

import jax
import jax.numpy as jnp
from jax.experimental import pallas as pl
from jax.experimental.pallas import tpu as pltpu


def _rffhs_kernel(w_aug_ref, xt_ref, beta_t_ref, y_ref):
    # w_aug_ref:  (dim_hidden, dim_in+1)  bf16  scale-folded W with b as last column (constant)
    # xt_ref:     (dim_in+1, block_n)     bf16  augmented x^T tile (streamed per grid step)
    # beta_t_ref: (dim_out, dim_hidden)   bf16  sqrt(2/H)-folded beta^T (constant)
    # y_ref:      (dim_out, block_n)      f32   lane-dense output tile
    z = jnp.dot(w_aug_ref[...], xt_ref[...],
                preferred_element_type=jnp.float32)            # MXU, f32 accumulation
    phi = jnp.cos(z)                                           # EUP transcendental, f32
    # TODO(synk): phi rounded to bf16 for the second MXU pass; fine at demo H, re-check at
    # dim_hidden in the thousands or keep f32.
    y = jnp.dot(beta_t_ref[...], phi.astype(beta_t_ref.dtype),
                preferred_element_type=jnp.float32)            # MXU, no in-kernel transpose
    y_ref[...] = y


def _choose_block_n(n, target):
    """Batch tile: multiple of 128 (lane axis of the transposed layout), capped so the grid
    has >= 2 steps whenever the padded batch allows it (both v7x TensorCores), and never
    larger than the padded batch."""
    target = max(128, (target // 128) * 128)
    n_pad = -(-n // 128) * 128
    if n_pad >= 256:
        target = min(target, max(128, (n_pad // 2) // 128 * 128))
    return min(target, n_pad)


def rffhs_forward(x, scales, w_t, b, beta, *, block_n=512):
    """x: (N, dim_in); scales: (dim_in,); w_t: (dim_in, dim_hidden);
    b: (dim_hidden,); beta: (dim_hidden, dim_out). Returns (N, dim_out) f32."""
    N, dim_in = x.shape
    dim_in_w, dim_hidden = w_t.shape
    assert dim_in == dim_in_w
    dim_out = beta.shape[1]

    bn = _choose_block_n(N, block_n)
    n_blocks = -(-N // bn)
    n_pad = n_blocks * bn
    d_aug = dim_in + 1

    # --- one-time wrapper-side folding (tiny constants, reused across the batch) ---
    # scale-folded W (dim_hidden, dim_in) with the Fourier phase b appended as a column
    w_scaled = (scales.reshape(dim_in, 1).astype(jnp.float32)
                * w_t.astype(jnp.float32)).T                                  # (H, dim_in)
    w_aug = jnp.concatenate(
        [w_scaled, b.reshape(dim_hidden, 1).astype(jnp.float32)], axis=1)     # (H, dim_in+1)
    # sqrt(2/H) folded into beta^T
    beta_t = (math.sqrt(2.0 / dim_hidden) * beta.astype(jnp.float32)).T       # (dim_out, H)
    # augmented, transposed input: the ones row pairs with the b column of W_aug
    x_aug_t = jnp.concatenate(
        [x.astype(jnp.float32), jnp.ones((N, 1), jnp.float32)], axis=1).T     # (dim_in+1, N)
    if n_pad != N:  # ragged tail: zero-pad; padded columns are sliced off below
        x_aug_t = jnp.pad(x_aug_t, ((0, 0), (0, n_pad - N)))

    # bf16 MXU operands; accumulation stays f32 via preferred_element_type.
    w_aug_bf = w_aug.astype(jnp.bfloat16)
    beta_t_bf = beta_t.astype(jnp.bfloat16)
    xt_bf = x_aug_t.astype(jnp.bfloat16)

    flops = 2 * n_pad * d_aug * dim_hidden + 2 * n_pad * dim_hidden * dim_out
    bytes_accessed = (xt_bf.size * 2 + w_aug_bf.size * 2 + beta_t_bf.size * 2
                      + dim_out * n_pad * 4)
    cost = pl.CostEstimate(flops=flops, transcendentals=n_pad * dim_hidden,
                           bytes_accessed=bytes_accessed)

    def build(single_buffer_weights):
        # Constant-index-map weight streams only need one VMEM buffer.
        const_kw = dict(pipeline_mode=pl.Buffered(1)) if single_buffer_weights else {}
        grid_spec = pltpu.PrefetchScalarGridSpec(
            num_scalar_prefetch=0,
            grid=(n_blocks,),
            in_specs=[
                pl.BlockSpec((dim_hidden, d_aug), lambda i: (0, 0), **const_kw),
                pl.BlockSpec((d_aug, bn), lambda i: (0, i)),
                pl.BlockSpec((dim_out, dim_hidden), lambda i: (0, 0), **const_kw),
            ],
            out_specs=pl.BlockSpec((dim_out, bn), lambda i: (0, i)),
        )
        return pl.pallas_call(
            _rffhs_kernel,
            out_shape=jax.ShapeDtypeStruct((dim_out, n_pad), jnp.float32),
            grid_spec=grid_spec,
            compiler_params=pltpu.CompilerParams(
                dimension_semantics=("parallel",)),
            cost_estimate=cost,
        )

    try:
        y_t = build(True)(w_aug_bf, xt_bf, beta_t_bf)
    except Exception:
        # pipeline_mode=pl.Buffered(1) unsupported on this jax build — identical kernel with
        # default double-buffering (any genuine error would re-raise from this path too).
        y_t = build(False)(w_aug_bf, xt_bf, beta_t_bf)

    # Kernel emits the lane-dense transposed layout; give callers (N, dim_out).
    return y_t[:, :N].T


def rffhs_reference_f32(x, scales, w_t, b, beta):
    phi = math.sqrt(2.0 / w_t.shape[1]) * jnp.cos((x * scales[None, :]) @ w_t + b[None, :])
    return phi @ beta


def rffhs_reference_bf16(x, scales, w_t, b, beta):
    """Reference mimicking the kernel's rounding: b folded into the augmented bf16 matmul,
    f32 accumulation, phi rounded to bf16 for the output matmul."""
    dim_in, dim_hidden = w_t.shape
    w_scaled = (scales.reshape(dim_in, 1) * w_t).T                            # (H, dim_in)
    w_aug = jnp.concatenate([w_scaled, b.reshape(dim_hidden, 1)], axis=1)     # (H, dim_in+1)
    x_aug = jnp.concatenate([x, jnp.ones((x.shape[0], 1), x.dtype)], axis=1)  # (N, dim_in+1)
    wr = w_aug.astype(jnp.bfloat16).astype(jnp.float32)
    xr = x_aug.astype(jnp.bfloat16).astype(jnp.float32)
    phi = jnp.cos(wr @ xr.T)                                                  # (H, N)
    beta_t = (math.sqrt(2.0 / dim_hidden) * beta).T                           # (dim_out, H)
    br = beta_t.astype(jnp.bfloat16).astype(jnp.float32)
    pr = phi.astype(jnp.bfloat16).astype(jnp.float32)
    return (br @ pr).T


if __name__ == "__main__":
    # Small shapes consistent with RffHs(dim_in, dim_out, dim_hidden).
    N, dim_in, dim_hidden, dim_out = 256, 16, 64, 1

    key = jax.random.PRNGKey(0)
    (k_x, k_w, k_b, k_eta, k_eps_nu, k_eps_eta,
     k_beta_mu, k_eps_beta) = jax.random.split(key, 8)

    x = jax.random.normal(k_x, (N, dim_in), dtype=jnp.float32)

    # --- RffHsLayer parameters (deterministic synthetic init) ---
    # Fixed random Fourier features: W ~ N(0, I), b ~ U(0, 2*pi)
    w = jax.random.normal(k_w, (dim_hidden, dim_in), dtype=jnp.float32)
    w_t = w.T
    b = 2.0 * math.pi * jax.random.uniform(k_b, (dim_hidden,), dtype=jnp.float32)

    # Horseshoe variational scales: s = nu * eta (lognormal reparam with fixed "sampled" eps)
    lognu_mu, lognu_sig = jnp.float32(-0.5), jnp.float32(0.1)
    logeta_mu = 0.1 * jax.random.normal(k_eta, (dim_in,), dtype=jnp.float32)
    logeta_sig = jnp.full((dim_in,), 0.1, dtype=jnp.float32)
    eps_nu = jax.random.normal(k_eps_nu, (), dtype=jnp.float32)
    eps_eta = jax.random.normal(k_eps_eta, (dim_in,), dtype=jnp.float32)
    nu = jnp.exp(lognu_mu + lognu_sig * eps_nu)            # global scale
    eta = jnp.exp(logeta_mu + logeta_sig * eps_eta)        # local scales
    scales = nu * eta                                      # (dim_in,)

    # --- LinearLayer (output) parameters: beta sampled via reparameterization ---
    beta_mu = 0.1 * jax.random.normal(k_beta_mu, (dim_hidden, dim_out), dtype=jnp.float32)
    beta_sig = jnp.full((dim_hidden, dim_out), 0.05, dtype=jnp.float32)
    eps_beta = jax.random.normal(k_eps_beta, (dim_hidden, dim_out), dtype=jnp.float32)
    beta = beta_mu + beta_sig * eps_beta
    # TODO(synk): LinearLayer's conjugate-Gaussian fixed_point_updates is host-side parameter
    # setup, not the forward hot path; approximated here by a reparameterized sample.

    # --- run 1: even batch (2 parallel grid steps -> both v7x TensorCores) ---
    y = jax.block_until_ready(rffhs_forward(x, scales, w_t, b, beta))
    assert y.shape == (N, dim_out)
    y_ref_bf16 = rffhs_reference_bf16(x, scales, w_t, b, beta)
    assert jnp.allclose(y, y_ref_bf16, atol=2e-3, rtol=2e-3), "mismatch vs bf16-consistent ref"
    y_ref_f32 = rffhs_reference_f32(x, scales, w_t, b, beta)
    assert jnp.allclose(y, y_ref_f32, atol=3e-2, rtol=3e-2), "mismatch vs f32 reference"

    # --- run 2: ragged batch (exercises the zero-padded last tile path) ---
    n_ragged = 200
    y_r = jax.block_until_ready(rffhs_forward(x[:n_ragged], scales, w_t, b, beta))
    assert y_r.shape == (n_ragged, dim_out)
    assert jnp.allclose(y_r, y_ref_bf16[:n_ragged], atol=2e-3, rtol=2e-3), "ragged-tail mismatch"

    print("KERNEL_OK")
</pallas_src>

<mosaic_0001>
module attributes {stable_mosaic.version = 11 : i64} {
  func.func @_rffhs_kernel(%arg0: i32, %arg1: memref<64x17xbf16, #tpu.memory_space<vmem>>, %arg2: memref<17x128xbf16, #tpu.memory_space<vmem>>, %arg3: memref<1x64xbf16, #tpu.memory_space<vmem>>, %arg4: memref<1x128xf32, #tpu.memory_space<vmem>>) attributes {dimension_semantics = [#tpu.dimension_semantics<parallel>], iteration_bounds = array<i64: 2>, scalar_prefetch = 0 : i64, scratch_operands = 0 : i64, tpu.core_type = #tpu.core_type<tc>, window_params = [{pipeline_mode = #tpu.pipeline_mode<synchronous>, transform_indices = @transform_0, window_bounds = array<i64: 64, 17>}, {transform_indices = @transform_1, window_bounds = array<i64: 17, 128>}, {pipeline_mode = #tpu.pipeline_mode<synchronous>, transform_indices = @transform_2, window_bounds = array<i64: 1, 64>}, {transform_indices = @transform_3, window_bounds = array<i64: 1, 128>}]} {
    %c0 = arith.constant 0 : index
    %c0_0 = arith.constant 0 : index
    %0 = vector.load %arg1[%c0, %c0_0] : memref<64x17xbf16, #tpu.memory_space<vmem>>, vector<64x17xbf16>
    %c0_1 = arith.constant 0 : index
    %c0_2 = arith.constant 0 : index
    %1 = vector.load %arg2[%c0_1, %c0_2] : memref<17x128xbf16, #tpu.memory_space<vmem>>, vector<17x128xbf16>
    %cst = arith.constant dense<0.000000e+00> : vector<64x128xf32>
    %2 = tpu.matmul %0, %1, %cst {dimension_numbers = #tpu.dot_dimension_numbers<[1], [0], [0], [1], [0, 0, 1, 1], [], []>} : vector<64x17xbf16>, vector<17x128xbf16>, vector<64x128xf32> -> vector<64x128xf32>
    %3 = math.cos %2 : vector<64x128xf32>
    %c0_3 = arith.constant 0 : index
    %c0_4 = arith.constant 0 : index
    %4 = vector.load %arg3[%c0_3, %c0_4] : memref<1x64xbf16, #tpu.memory_space<vmem>>, vector<1x64xbf16>
    %5 = arith.truncf %3 : vector<64x128xf32> to vector<64x128xbf16>
    %cst_5 = arith.constant dense<0.000000e+00> : vector<1x128xf32>
    %6 = tpu.matmul %4, %5, %cst_5 {dimension_numbers = #tpu.dot_dimension_numbers<[1], [0], [0], [1], [0, 0, 1, 1], [], []>} : vector<1x64xbf16>, vector<64x128xbf16>, vector<1x128xf32> -> vector<1x128xf32>
    %c0_6 = arith.constant 0 : index
    %c0_7 = arith.constant 0 : index
    %7 = vector.load %arg4[%c0_6, %c0_7] : memref<1x128xf32, #tpu.memory_space<vmem>>, vector<1x128xf32>
    tpu.vector_store %arg4[%c0_6, %c0_7], %6 {strides = array<i32>} : memref<1x128xf32, #tpu.memory_space<vmem>>, vector<1x128xf32>,
    return
  }
  func.func @transform_0(%arg0: i32) -> (i32, i32) {
    %c0_i32 = arith.constant 0 : i32
    %c0_i32_0 = arith.constant 0 : i32
    %c0_i32_1 = arith.constant 0 : i32
    return %c0_i32, %c0_i32_0 : i32, i32
  }
  func.func @transform_1(%arg0: i32) -> (i32, i32) {
    %c0_i32 = arith.constant 0 : i32
    %c0_i32_0 = arith.constant 0 : i32
    return %c0_i32, %arg0 : i32, i32
  }
  func.func @transform_2(%arg0: i32) -> (i32, i32) {
    %c0_i32 = arith.constant 0 : i32
    %c0_i32_0 = arith.constant 0 : i32
    %c0_i32_1 = arith.constant 0 : i32
    return %c0_i32, %c0_i32_0 : i32, i32
  }
  func.func @transform_3(%arg0: i32) -> (i32, i32) {
    %c0_i32 = arith.constant 0 : i32
    %c0_i32_0 = arith.constant 0 : i32
    return %c0_i32, %arg0 : i32, i32
  }
}

module attributes {stable_mosaic.version = 11 : i64} {
  func.func @_rffhs_kernel(%arg0: i32, %arg1: memref<64x17xbf16, #tpu.memory_space<vmem>>, %arg2: memref<17x128xbf16, #tpu.memory_space<vmem>>, %arg3: memref<1x64xbf16, #tpu.memory_space<vmem>>, %arg4: memref<1x128xf32, #tpu.memory_space<vmem>>) attributes {dimension_semantics = [#tpu.dimension_semantics<parallel>], iteration_bounds = array<i64: 2>, scalar_prefetch = 0 : i64, scratch_operands = 0 : i64, tpu.core_type = #tpu.core_type<tc>, window_params = [{pipeline_mode = #tpu.pipeline_mode<synchronous>, transform_indices = @transform_0, window_bounds = array<i64: 64, 17>}, {transform_indices = @transform_1, window_bounds = array<i64: 17, 128>}, {pipeline_mode = #tpu.pipeline_mode<synchronous>, transform_indices = @transform_2, window_bounds = array<i64: 1, 64>}, {transform_indices = @transform_3, window_bounds = array<i64: 1, 128>}]} {
    %c0 = arith.constant 0 : index
    %c0_0 = arith.constant 0 : index
    %0 = vector.load %arg1[%c0, %c0_0] : memref<64x17xbf16, #tpu.memory_space<vmem>>, vector<64x17xbf16>
    %c0_1 = arith.constant 0 : index
    %c0_2 = arith.constant 0 : index
    %1 = vector.load %arg2[%c0_1, %c0_2] : memref<17x128xbf16, #tpu.memory_space<vmem>>, vector<17x128xbf16>
    %cst = arith.constant dense<0.000000e+00> : vector<64x128xf32>
    %2 = tpu.matmul %0, %1, %cst {dimension_numbers = #tpu.dot_dimension_numbers<[1], [0], [0], [1], [0, 0, 1, 1], [], []>} : vector<64x17xbf16>, vector<17x128xbf16>, vector<64x128xf32> -> vector<64x128xf32>
    %3 = math.cos %2 : vector<64x128xf32>
    %c0_3 = arith.constant 0 : index
    %c0_4 = arith.constant 0 : index
    %4 = vector.load %arg3[%c0_3, %c0_4] : memref<1x64xbf16, #tpu.memory_space<vmem>>, vector<1x64xbf16>
    %5 = arith.truncf %3 : vector<64x128xf32> to vector<64x128xbf16>
    %cst_5 = arith.constant dense<0.000000e+00> : vector<1x128xf32>
    %6 = tpu.matmul %4, %5, %cst_5 {dimension_numbers = #tpu.dot_dimension_numbers<[1], [0], [0], [1], [0, 0, 1, 1], [], []>} : vector<1x64xbf16>, vector<64x128xbf16>, vector<1x128xf32> -> vector<1x128xf32>
    %c0_6 = arith.constant 0 : index
    %c0_7 = arith.constant 0 : index
    %7 = vector.load %arg4[%c0_6, %c0_7] : memref<1x128xf32, #tpu.memory_space<vmem>>, vector<1x128xf32>
    tpu.vector_store %arg4[%c0_6, %c0_7], %6 {strides = array<i32>} : memref<1x128xf32, #tpu.memory_space<vmem>>, vector<1x128xf32>,
    return
  }
  func.func @transform_0(%arg0: i32) -> (i32, i32) {
    %c0_i32 = arith.constant 0 : i32
    %c0_i32_0 = arith.constant 0 : i32
    %c0_i32_1 = arith.constant 0 : i32
    return %c0_i32, %c0_i32_0 : i32, i32
  }
  func.func @transform_1(%arg0: i32) -> (i32, i32) {
    %c0_i32 = arith.constant 0 : i32
    %c0_i32_0 = arith.constant 0 : i32
    return %c0_i32, %arg0 : i32, i32
  }
  func.func @transform_2(%arg0: i32) -> (i32, i32) {
    %c0_i32 = arith.constant 0 : i32
    %c0_i32_0 = arith.constant 0 : i32
    %c0_i32_1 = arith.constant 0 : i32
    return %c0_i32, %c0_i32_0 : i32, i32
  }
  func.func @transform_3(%arg0: i32) -> (i32, i32) {
    %c0_i32 = arith.constant 0 : i32
    %c0_i32_0 = arith.constant 0 : i32
    return %c0_i32, %arg0 : i32, i32
  }
}

</mosaic_0001>

<bundles_post_ra>
// kernel: tpu_custom_call.1
= control target key start
LH: loop header
LB: loop body
LE: loop exit
PB: predicated region body
PF: predicated region fallthrough
CT: control target
= control target key end

     0   :  { %8 = vsyncpa [#allocation4], 0  ;;  %s2393_s0 = inlined_call_operand.vmem [shape: bf16[64,17], index: 0, kind: input, shape index: {}]   ;;  %s2394_s1 = inlined_call_operand.vmem [shape: bf16[17,256], index: 1, kind: input, shape index: {}]   ;;  %s2395_s2 = inlined_call_operand.vmem [shape: bf16[1,64], index: 2, kind: input, shape index: {}]   ;;  %s2396_s3 = inlined_call_operand.hbm [shape: f32[1,256], index: 3, kind: output, shape index: {}]  }
   0x1   :  { %10 = vsyncpa [#allocation4 + $0x1], 0  ;;  %s1590_s12 = smov 0   ;;  %s1592_s13 = smov 0  }
   0x2   :  { %s1594_s14 = smov 0   ;;  %s1596_s15 = smov 0  }
   0x3 LB: > { %s1289_s16 = sadd.s32 4294967295, %s1558_s15   ;;  %s1290_s17 = sadd.s32 4294967294, %s1558_s15   ;;  %s1558_s15 = sphi %s1596_s15, %s2418_s15   ;;  %s1554_s14 = sphi %s1594_s14, %s2417_s14   ;;  %s1550_s13 = sphi %s1592_s13, %s2416_s13   ;;  %s1546_s12 = sphi %s1590_s12, %s2415_s12  }
   0x4   : > { %s1613_s18 = sadd.s32 1, %s1558_s15   ;;  %s44_s19 = sadd.s32 1, %s1554_s14 }
   0x5   : > { %s41_s20 = ssub.s32 %s1558_s15, %s1613_s18  ;;  %p51_p0 = scmp.ne.s32.totalorder %s1554_s14, %s1550_s13 }
   0x6   : > { %p42_p1 = scmp.eq.s32.totalorder %s41_s20, 0  ;;  %p52_p2 = scmp.eq.s32.totalorder %s1558_s15, 0 }
   0x7   : > { %p102_p3 = scmp.eq.s32.totalorder %s1289_s16, 1  ;;  %p107_p4 = scmp.ne.s32.totalorder %s1550_s13, %s1546_s12 }
   0x8   : > { %s1626_s21 = scalar_select %p42_p1, %s1554_s14, %s44_s19  }
   0x9   : > { %p53_p5 = por %p52_p2, %p51_p0  ;;  %p1628_p6 = por %p102_p3, %p51_p0 }
   0xa   : > { %p108_p7 = scmp.eq.s32.totalorder %s1290_s17, 1  ;;  %p1292_p9 = scmp.ge.s32.totalorder %s1558_s15, 2 }
   0xc   : > { %p1632_p8 = por %p108_p7, %p107_p4  ;;  %130 = sbr.rel (%p1292_p9) target bundleno = 26 (0x1a), region = 24 }
  0x13   : > { %133 = sbr.rel (!%p53_p5) target bundleno = 26 (0x1a), region = 28  ;;  %s135_s24 = sand.u32 (%p53_p5), 1, %s1554_s14  }
  0x14   : > { %s1293_s25 = sshll.u32 (%p53_p5), %s1558_s15, 2  ;;  %s1376_s26 = smul.u32 (%p53_p5), 12, %s135_s24 }
  0x15   : > { %s139_s29 = scalar_lea.vmem (%p53_p5), %s2394_s1, %s1293_s25 }
  0x16   : > { %v155_v0 = vld [vmem:[%s139_s29] sm:$0xf] (%p53_p5)  ;;  %v157_v1 = vld [vmem:[%s139_s29 + $0x8] sm:$0xf] (%p53_p5)  ;;  %v159_v2 = vld [vmem:[%s139_s29 + $0x10] sm:$0xf] (%p53_p5) }
  0x17   : > { %s137_s30 = scalar_lea.vmem (%p53_p5), [#allocation2], %s1376_s26 }
  0x18   : > { %156 = vst [vmem:[%s137_s30] sm:$0xf] (%p53_p5), %v155_v0  ;;  %158 = vst [vmem:[%s137_s30 + $0x4] sm:$0xf] (%p53_p5), %v157_v1 }
  0x19   : > { %160 = vst [vmem:[%s137_s30 + $0x8] sm:$0xf] (%p53_p5), %v159_v2 }
  0x1a PF: > { %p1294_p10 = scmp.ge.s32.totalorder %s1558_s15, 1  ;;  %p188_p11 = scmp.lt.s32.totalorder %s1558_s15, 3 }
  0x1c   : > { %p189_p12 = pnand %p1294_p10, %p188_p11 }
  0x1d   : > { %s1647_s4 = sand.u32 (!%p189_p12), 1, %s1550_s13   ;;  %v1460_v3 = vld [vmem:[%s2393_s0] sm:$0xff] (!%p189_p12)   ;;  %vm271_vm0 = vcmask (!%p189_p12), 1040384   ;;  %vm258_vm1 = vcmask (!%p189_p12), 138240   ;;  %v1560_v5 = vmov (!%p189_p12), 0   ;;  %v1461_v9 = vld [vmem:[%s2393_s0 + $0x8] sm:$0xff] (!%p189_p12)  }
  0x1e   : > { %192 = sbr.rel (%p189_p12) target bundleno = 706 (0x2c2), region = 69  ;;  %1356 = vmatprep.mubr.msk.bf16.mxu0 (!%p189_p12), %vm258_vm1, %v1460_v3  ;;  %v273_v6 = vsel (!%p189_p12), %vm271_vm0, 65535, %v1560_v5  ;;  %v1462_v10 = vld [vmem:[%s2393_s0 + $0x10] sm:$0xff] (!%p189_p12)   ;;  %v1463_v11 = vld [vmem:[%s2393_s0 + $0x18] sm:$0xff] (!%p189_p12)   ;;  %v1561_v47 = vmov (!%p189_p12), 683565275  }
  0x1f   : > { %s1377_s7 = smul.u32 (!%p189_p12), 12, %s1647_s4  ;;  %v1562_v51 = vmov (!%p189_p12), 2475754826   ;;  %v1563_v53 = vmov (!%p189_p12), 2131351028   ;;  %s216_s26 = scalar_lea.vmem (!%p189_p12), [#allocation3], %s1647_s4 }
  0x20   : > { %v1564_v55 = vmov (!%p189_p12), 2102212464   ;;  %v1565_v57 = vmov (!%p189_p12), 920167782   ;;  %v1566_v0 = vmov (!%p189_p12), 1326507024  }
  0x21   : > { %s197_s8 = scalar_lea.vmem (!%p189_p12), [#allocation2], %s1377_s7  ;;  %s1229_s27 = sshll.u32 (!%p189_p12), %s216_s26, 4  ;;  %s2346_s27 = int_to_ptr.vmem [resolvable:$true] %s1229_s27 }
  0x22   : > { %v1458_v4 = vld [vmem:[%s197_s8] sm:$0xff] (!%p189_p12)   ;;  %v1459_v7 = vld [vmem:[%s197_s8 + $0x8] ss:$0 sps:$4 sm:$0x11] (!%p189_p12)   ;;  %s1338_s28 = sshll.u32 (!%p189_p12), %s1289_s16, 4  ;;  %s1217_s6 = scalar_lea.sflag (!%p189_p12), [#allocation4], %s1647_s4 }
  0x23   : > { %1352 = vmatprep.subr.bf16.mxu0 (!%p189_p12), %v1458_v4  ;;  %v275_v8 = vand.u32 (!%p189_p12), %v1459_v7, %v273_v6  ;;  %s2351_s5 = scalar_lea.hbm (!%p189_p12), %s2396_s3, %s1338_s28  ;;  %s1496_s7 = scalar_lea.vmem (!%p189_p12), %s2346_s27, 16 }
  0x24   : > { %1353 = vmatpush3.bf16.msra.mxu0 (!%p189_p12), %v1458_v4  ;;  %p1497_p13 = scmp.ne.s32.totalorder (!%p189_p12), %s2346_s27, %s1496_s7  ;;  %s1569_s16 = smov (!%p189_p12), [#allocation3]  }
  0x25   : > { %1354 = vmatprep.subr.bf16.mxu0 %v275_v8  ;;  %s1500_s8 = sshll.u32 %s1569_s16, 4  ;;  %s1501_s8 = int_to_ptr.vmem [resolvable:$false] %s1500_s8 }
  0x26   : > { %p1498_p0 = pnand %p1497_p13, %p1628_p6  ;;  %s1502_s9 = scalar_lea.vmem %s1501_s8, 32 }
  0x27   : > { %p1503_p2 = scmp.lt.s32.totalorder %s2346_s27, %s1501_s8  ;;  %p1504_p3 = scmp.lt.s32.totalorder %s1502_s9, %s1496_s7 }
  0x28   : > { %1355 = vmatpush3.bf16.msra.mxu0 %v275_v8  ;;  %p1499_p1 = pneg %p1498_p0 }
  0x29   : > { %p1505_p4 = por %p1504_p3, %p1503_p2 }
  0x2b   : > { %1357 = vmatmul.mubr.msk.bf16.vlgmr.msra.gmra.mrb[0].mxu0 %vm258_vm1, %v1461_v9  ;;  %p1506_p5 = pnand %p1505_p4, %p1499_p1 }
  0x2c   : > { %1360 = vmatprep.mubr.msk.bf16.mxu0 %vm258_vm1, %v1462_v10 }
  0x33   : > { %1361 = vmatmul.mubr.msk.bf16.gmra.mrb[4].mxu0 %vm258_vm1, %v1463_v11 }
  0xfe   : > { %v1666_v12 = vpop.f32.mrb[0].mxu0 }
  0xff   : > { %v548_v13 = vand.u32 2147483647, %v1666_v12  ;;  %v551_v14 = vand.u32 2139095040, %v1666_v12  ;;  %v1670_v15 = vpop.f32.mrb[1].mxu0 }
 0x100   : > { %v342_v16 = vand.u32 2147483647, %v1670_v15  ;;  %v345_v17 = vand.u32 2139095040, %v1670_v15  ;;  %v1674_v18 = vpop.f32.mrb[2].mxu0 }
 0x101   : > { %v552_v19 = vshrl.u32 %v551_v14, 23  ;;  %v555_v20 = vand.u32 8388607, %v548_v13  ;;  %v654_v23 = vand.u32 2139095040, %v1674_v18  ;;  %v1681_v25 = vpop.f32.mrb[3].mxu0 }
 0x102   : > { %v346_v21 = vshrl.u32 %v345_v17, 23  ;;  %v349_v22 = vand.u32 8388607, %v342_v16  ;;  %v651_v32 = vand.u32 2147483647, %v1674_v18 }
 0x103   : > { %v1313_v24 = vadd.s32 4294967169, %v552_v19  ;;  %v655_v27 = vshrl.u32 %v654_v23, 23  ;;  %v556_v28 = vor.u32 8388608, %v555_v20 }
 0x104   : > { %v1305_v26 = vadd.s32 4294967169, %v346_v21  ;;  %v350_v30 = vor.u32 8388608, %v349_v22  ;;  %v1698_v44 = vand.u32 8388607, %v651_v32 }
 0x105   : > { %v558_v29 = vadd.s32 1, %v1313_v24  ;;  %v1317_v33 = vadd.s32 4294967169, %v655_v27  ;;  %v1692_v42 = vshll.u32 %v556_v28, 8 }
 0x106   : > { %v352_v31 = vadd.s32 1, %v1305_v26  ;;  %v1684_v34 = vpop.f32.mrb[4].mxu0  ;;  %v1694_v43 = vshll.u32 %v350_v30, 8 }
 0x107   : > { %vm559_vm2 = vcmp.gt.s32.totalorder %v558_v29, 0  ;;  %v1686_v35 = vpop.f32.mrb[5].mxu0  ;;  %v1700_v45 = vadd.s32 1, %v1317_v33 }
 0x108   : > { %v560_v36 = vsel %vm559_vm2, %v558_v29, 0  ;;  %vm353_vm3 = vcmp.gt.s32.totalorder %v352_v31, 0  ;;  %v1688_v37 = vpop.f32.mrb[6].mxu0 }
 0x109   : > { %v561_v38 = vshrl.u32 %v560_v36, 5  ;;  %v562_v39 = vand.u32 31, %v560_v36  ;;  %v354_v40 = vsel %vm353_vm3, %v352_v31, 0  ;;  %v1690_v41 = vpop.f32.mrb[7].mxu0  ;;  %vm662_vm8 = vcmp.gt.s32.totalorder %v1700_v45, 0 }
 0x10a   : > { %v1703_v49 = vshrl.u32 %v354_v40, 5  ;;  %v356_v50 = vand.u32 31, %v354_v40 }
 0x10b   : > { %v563_v46 = vsub.s32 32, %v562_v39  ;;  %v565_v48 = vshll.u32 %v1561_v47, %v562_v39  ;;  %v568_v52 = vshll.u32 %v1562_v51, %v562_v39  ;;  %v571_v54 = vshll.u32 %v1563_v53, %v562_v39 }
 0x10c   : > { %v574_v56 = vshll.u32 %v1564_v55, %v562_v39  ;;  %v577_v58 = vshll.u32 %v1565_v57, %v562_v39  ;;  %vm580_vm4 = vcmp.lt.s32.totalorder %v561_v38, 1  ;;  %vm581_vm5 = vcmp.lt.s32.totalorder %v561_v38, 2 }
 0x10d   : > { %v566_v59 = vshrl.u32 %v1562_v51, %v563_v46  ;;  %v569_v60 = vshrl.u32 %v1563_v53, %v563_v46  ;;  %v572_v61 = vshrl.u32 %v1564_v55, %v563_v46  ;;  %v564_v62 = vshrl.u32 %v1561_v47, %v563_v46 }
 0x10e   : > { %v575_v63 = vshrl.u32 %v1565_v57, %v563_v46  ;;  %v578_v1 = vshrl.u32 %v1566_v0, %v563_v46  ;;  %v357_v5 = vsub.s32 32, %v356_v50  ;;  %vm582_vm6 = vcmp.lt.s32.totalorder %v561_v38, 3 }
 0x10f   : > { %v567_v2 = vor.u32 %v566_v59, %v565_v48  ;;  %v570_v3 = vor.u32 %v569_v60, %v568_v52  ;;  %v573_v4 = vor.u32 %v572_v61, %v571_v54  ;;  %vm583_vm7 = vcmp.lt.s32.totalorder %v561_v38, 4 }
 0x110   : > { %v576_v6 = vor.u32 %v575_v63, %v574_v56  ;;  %v579_v7 = vor.u32 %v578_v1, %v577_v58  ;;  %v359_v20 = vshll.u32 %v1561_v47, %v356_v50  ;;  %v360_v23 = vshrl.u32 %v1562_v51, %v357_v5 }
 0x111   : > { %v584_v8 = vsel %vm580_vm4, %v564_v62, %v567_v2  ;;  %v585_v9 = vsel %vm583_vm7, %v573_v4, 2102212464  ;;  %v588_v10 = vsel %vm580_vm4, %v567_v2, %v570_v3  ;;  %v592_v11 = vsel %vm580_vm4, %v570_v3, %v573_v4 }
 0x112   : > { %v586_v14 = vsel %vm582_vm6, %v570_v3, %v585_v9  ;;  %v589_v17 = vsel %vm583_vm7, %v576_v6, 920167782  ;;  %v593_v19 = vsel %vm583_vm7, %v579_v7, 1326507024  ;;  %v362_v24 = vshll.u32 %v1562_v51, %v356_v50 }
 0x113   : > { %v590_v21 = vsel %vm582_vm6, %v573_v4, %v589_v17  ;;  %v594_v22 = vsel %vm582_vm6, %v576_v6, %v593_v19  ;;  %v587_v26 = vsel %vm581_vm5, %v584_v8, %v586_v14  ;;  %v363_v29 = vshrl.u32 %v1563_v53, %v357_v5 }
 0x114   : > { %v591_v27 = vsel %vm581_vm5, %v588_v10, %v590_v21  ;;  %v595_v28 = vsel %vm581_vm5, %v592_v11, %v594_v22  ;;  %v361_v39 = vor.u32 %v360_v23, %v359_v20  ;;  %v365_v46 = vshll.u32 %v1563_v53, %v356_v50 }
 0x115   : > { %v1727_v30 = vmul.u32.u64.low %v1692_v42, %v595_v28  ;;  %v1728_v31 = vmul.u32.u64.high %v1692_v42, %v595_v28, %v1727_v30  ;;  %v1731_v33 = vmul.u32.u64.low %v1692_v42, %v591_v27  ;;  %v1732_v36 = vmul.u32.u64.high %v1692_v42, %v591_v27, %v1731_v33 }
 0x116   : > { %v364_v40 = vor.u32 %v363_v29, %v362_v24  ;;  %v366_v48 = vshrl.u32 %v1564_v55, %v357_v5  ;;  %v358_v38 = vshrl.u32 %v1561_v47, %v357_v5  ;;  %v368_v52 = vshll.u32 %v1564_v55, %v356_v50 }
 0x117   : > { %v369_v54 = vshrl.u32 %v1565_v57, %v357_v5  ;;  %v372_v56 = vshrl.u32 %v1566_v0, %v357_v5  ;;  %v603_v58 = vmul.u32 %v1692_v42, %v587_v26  ;;  %v371_v60 = vshll.u32 %v1565_v57, %v356_v50 }
 0x118   : > { %v367_v59 = vor.u32 %v366_v48, %v365_v46  ;;  %vm374_vm9 = vcmp.lt.s32.totalorder %v1703_v49, 1  ;;  %vm605_vm10 = vc.u32 %v1728_v31, %v1731_v33  ;;  %v606_v61 = vadd.s32 1, %v1732_v36 }
 0x119   : > { %v370_v62 = vor.u32 %v369_v54, %v368_v52  ;;  %vm375_vm11 = vcmp.lt.s32.totalorder %v1703_v49, 2  ;;  %v373_v63 = vor.u32 %v372_v56, %v371_v60  ;;  %vm376_vm12 = vcmp.lt.s32.totalorder %v1703_v49, 3 }
 0x11a   : > { %vm377_vm13 = vcmp.lt.s32.totalorder %v1703_v49, 4  ;;  %v382_v1 = vsel %vm374_vm9, %v361_v39, %v364_v40  ;;  %v607_v42 = vsel %vm605_vm10, %v606_v61, %v1732_v36  ;;  %v386_v3 = vsel %vm374_vm9, %v364_v40, %v367_v59 }
 0x11b   : > { %v379_v2 = vsel %vm377_vm13, %v367_v59, 2102212464  ;;  %v383_v50 = vsel %vm377_vm13, %v370_v62, 920167782  ;;  %v608_v4 = vadd.s32 %v607_v42, %v603_v58  ;;  %v378_v5 = vsel %vm374_vm9, %v358_v38, %v361_v39 }
 0x11c   : > { %v384_v6 = vsel %vm376_vm12, %v367_v59, %v383_v50  ;;  %v387_v7 = vsel %vm377_vm13, %v373_v63, 1326507024  ;;  %v380_v8 = vsel %vm376_vm12, %v364_v40, %v379_v2  ;;  %v663_v11 = vsel %vm662_vm8, %v1700_v45, 0 }
 0x11d   : > { %v385_v9 = vsel %vm375_vm11, %v382_v1, %v384_v6  ;;  %v388_v10 = vsel %vm376_vm12, %v370_v62, %v387_v7  ;;  %v609_v14 = vadd.s32 536870912, %v608_v4  ;;  %v448_v23 = vand.u32 2139095040, %v1681_v25 }
 0x11e   : > { %v389_v17 = vsel %vm375_vm11, %v386_v3, %v388_v10  ;;  %v1759_v19 = vmul.u32.u64.low %v1694_v43, %v385_v9  ;;  %v1760_v20 = vmul.u32.u64.high %v1694_v43, %v385_v9, %v1759_v19  ;;  %v381_v45 = vsel %vm375_vm11, %v378_v5, %v380_v8 }
 0x11f   : > { %v1764_v21 = vmul.u32.u64.low %v1694_v43, %v389_v17  ;;  %v1765_v22 = vmul.u32.u64.high %v1694_v43, %v389_v17, %v1764_v21  ;;  %v1768_v24 = vshrl.u32 %v609_v14, 30  ;;  %v665_v26 = vand.u32 31, %v663_v11 }
 0x120   : > { %v400_v28 = vadd.s32 1, %v1760_v20  ;;  %v659_v29 = vor.u32 8388608, %v1698_v44  ;;  %v397_v36 = vmul.u32 %v1694_v43, %v381_v45  ;;  %v449_v39 = vshrl.u32 %v448_v23, 23 }
 0x121   : > { %v611_v27 = vshll.u32 %v1768_v24, 30  ;;  %v666_v30 = vsub.s32 32, %v665_v26  ;;  %vm399_vm14 = vc.u32 %v1765_v22, %v1759_v19  ;;  %v664_v49 = vshrl.u32 %v663_v11, 5 }
 0x122   : > { %v401_v46 = vsel %vm399_vm14, %v400_v28, %v1760_v20  ;;  %v668_v48 = vshll.u32 %v1561_v47, %v665_v26  ;;  %v671_v54 = vshll.u32 %v1562_v51, %v665_v26  ;;  %v674_v56 = vshll.u32 %v1563_v53, %v665_v26 }
 0x123   : > { %v1778_v40 = vsub.s32 %v608_v4, %v611_v27  ;;  %v402_v38 = vadd.s32 %v401_v46, %v397_v36  ;;  %v669_v52 = vshrl.u32 %v1562_v51, %v666_v30  ;;  %v672_v44 = vshrl.u32 %v1563_v53, %v666_v30 }
 0x124   : > { %v675_v58 = vshrl.u32 %v1564_v55, %v666_v30  ;;  %v1788_v59 = vshll.u32 %v659_v29, 8  ;;  %v1309_v63 = vadd.s32 4294967169, %v449_v39  ;;  %v677_v2 = vshll.u32 %v1564_v55, %v665_v26 }
 0x125   : > { %v614_v43 = vsub.s32 0, %v1778_v40  ;;  %v403_v60 = vadd.s32 536870912, %v402_v38  ;;  %v670_v61 = vor.u32 %v669_v52, %v668_v48  ;;  %v673_v62 = vor.u32 %v672_v44, %v671_v54 }
 0x126   : > { %v676_v42 = vor.u32 %v675_v58, %v674_v56  ;;  %v678_v50 = vshrl.u32 %v1565_v57, %v666_v30  ;;  %v680_v4 = vshll.u32 %v1565_v57, %v665_v26  ;;  %v681_v5 = vshrl.u32 %v1566_v0, %v666_v30 }
 0x127   : > { %v1314_v1 = vmin.u32 %v614_v43, %v1778_v40  ;;  %v1793_v3 = vshrl.u32 %v403_v60, 30  ;;  %vm683_vm15 = vcmp.lt.s32.totalorder %v664_v49, 1  ;;  %vm684_vm0 = vcmp.lt.s32.totalorder %v664_v49, 2 }
 0x128   : > { %v679_v7 = vor.u32 %v678_v50, %v677_v2  ;;  %vm685_vm1 = vcmp.lt.s32.totalorder %v664_v49, 3  ;;  %v682_v9 = vor.u32 %v681_v5, %v680_v4  ;;  %vm686_vm2 = vcmp.lt.s32.totalorder %v664_v49, 4 }
 0x129   : > { %v616_v6 = vclz %v1314_v1  ;;  %v405_v8 = vshll.u32 %v1793_v3, 30  ;;  %v691_v10 = vsel %vm683_vm15, %v670_v61, %v673_v62  ;;  %v695_v17 = vsel %vm683_vm15, %v673_v62, %v676_v42 }
 0x12a   : > { %v692_v14 = vsel %vm686_vm2, %v679_v7, 920167782  ;;  %v455_v20 = vadd.s32 1, %v1309_v63  ;;  %v667_v23 = vshrl.u32 %v1561_v47, %v666_v30  ;;  %v696_v26 = vsel %vm686_vm2, %v682_v9, 1326507024 }
 0x12b   : > { %v1315_v11 = vadd.s32 4294967294, %v616_v6  ;;  %v1800_v21 = vsub.s32 %v402_v38, %v405_v8  ;;  %v693_v45 = vsel %vm685_vm1, %v676_v42, %v692_v14  ;;  %v688_v27 = vsel %vm686_vm2, %v676_v42, 2102212464 }
 0x12c   : > { %v694_v28 = vsel %vm684_vm0, %v691_v10, %v693_v45  ;;  %v697_v29 = vsel %vm685_vm1, %v679_v7, %v696_v26  ;;  %vm456_vm4 = vcmp.gt.s32.totalorder %v455_v20, 0  ;;  %v687_v48 = vsel %vm683_vm15, %v667_v23, %v670_v61 }
 0x12d   : > { %vm1316_vm3 = vcmp.lt.s32.totalorder %v1315_v11, 0  ;;  %v408_v39 = vsub.s32 0, %v1800_v21  ;;  %v698_v46 = vsel %vm684_vm0, %v695_v17, %v697_v29  ;;  %v445_v38 = vand.u32 2147483647, %v1681_v25 }
 0x12e   : > { %v619_v36 = vsel %vm1316_vm3, 0, %v1315_v11  ;;  %v457_v30 = vsel %vm456_vm4, %v455_v20, 0  ;;  %v689_v54 = vsel %vm685_vm1, %v673_v62, %v688_v27  ;;  %v604_v6 = vadd.s32 %v1731_v33, %v1728_v31 }
 0x12f   : > { %v1306_v52 = vmin.u32 %v408_v39, %v1800_v21  ;;  %v1813_v44 = vmul.u32.u64.low %v1788_v59, %v698_v46  ;;  %v1814_v43 = vmul.u32.u64.high %v1788_v59, %v698_v46, %v1813_v44  ;;  %v624_v56 = vsub.s32 4294967266, %v619_v36 }
 0x130   : > { %v1817_v58 = vmul.u32.u64.low %v1788_v59, %v694_v28  ;;  %v1818_v60 = vmul.u32.u64.high %v1788_v59, %v694_v28, %v1817_v58  ;;  %v459_v1 = vand.u32 31, %v457_v30  ;;  %v690_v61 = vsel %vm684_vm0, %v687_v48, %v689_v54 }
 0x131   : > { %v410_v63 = vclz %v1306_v52  ;;  %v452_v62 = vand.u32 8388607, %v445_v38  ;;  %v625_v50 = vadd.s32 127, %v624_v56  ;;  %v706_v5 = vmul.u32 %v1788_v59, %v690_v61 }
 0x132   : > { %vm708_vm5 = vc.u32 %v1814_v43, %v1817_v58  ;;  %v460_v2 = vsub.s32 32, %v459_v1  ;;  %v709_v4 = vadd.s32 1, %v1818_v60  ;;  %v620_v7 = vsub.s32 32, %v619_v36 }
 0x133   : > { %v1307_v42 = vadd.s32 4294967294, %v410_v63  ;;  %v453_v10 = vor.u32 8388608, %v452_v62  ;;  %v626_v17 = vshll.u32 %v625_v50, 23  ;;  %v634_v20 = vsub.s32 4, %v1768_v24 }
 0x134   : > { %v710_v8 = vsel %vm708_vm5, %v709_v4, %v1818_v60  ;;  %v463_v11 = vshrl.u32 %v1562_v51, %v460_v2  ;;  %v466_v14 = vshrl.u32 %v1563_v53, %v460_v2  ;;  %v398_v59 = vadd.s32 %v1759_v19, %v1765_v22 }
 0x135   : > { %vm1308_vm6 = vcmp.lt.s32.totalorder %v1307_v42, 0  ;;  %v711_v9 = vadd.s32 %v710_v8, %v706_v5  ;;  %v462_v33 = vshll.u32 %v1561_v47, %v459_v1  ;;  %v465_v45 = vshll.u32 %v1562_v51, %v459_v1 }
 0x136   : > { %v1830_v49 = vsel %vm1308_vm6, 0, %v1307_v42  ;;  %v469_v26 = vshrl.u32 %v1564_v55, %v460_v2  ;;  %v622_v27 = vshrl.u32 %v604_v6, %v620_v7  ;;  %v458_v28 = vshrl.u32 %v457_v30, 5 }
 0x137   : > { %v418_v23 = vsub.s32 4294967266, %v1830_v49  ;;  %v712_v31 = vadd.s32 536870912, %v711_v9  ;;  %v471_v29 = vshll.u32 %v1564_v55, %v459_v1  ;;  %v472_v39 = vshrl.u32 %v1565_v57, %v460_v2 }
 0x138   : > { %v464_v48 = vor.u32 %v463_v11, %v462_v33  ;;  %v467_v52 = vor.u32 %v466_v14, %v465_v45  ;;  %v468_v19 = vshll.u32 %v1563_v53, %v459_v1  ;;  %v474_v44 = vshll.u32 %v1565_v57, %v459_v1 }
 0x139   : > { %v1844_v46 = vshrl.u32 %v712_v31, 30  ;;  %v419_v22 = vadd.s32 127, %v418_v23  ;;  %v473_v54 = vor.u32 %v472_v39, %v471_v29  ;;  %v475_v56 = vshrl.u32 %v1566_v0, %v460_v2 }
 0x13a   : > { %v621_v60 = vshll.u32 %v1778_v40, %v619_v36  ;;  %v627_v63 = vor.u32 4788187, %v626_v17  ;;  %v470_v61 = vor.u32 %v469_v26, %v468_v19  ;;  %v414_v42 = vsub.s32 32, %v1830_v49 }
 0x13b   : > { %v714_v30 = vshll.u32 %v1844_v46, 30  ;;  %v476_v62 = vor.u32 %v475_v56, %v474_v44  ;;  %vm477_vm7 = vcmp.lt.s32.totalorder %v458_v28, 1  ;;  %vm478_vm8 = vcmp.lt.s32.totalorder %v458_v28, 2 }
 0x13c   : > { %v623_v50 = vor.u32 %v622_v27, %v621_v60  ;;  %vm479_vm9 = vcmp.lt.s32.totalorder %v458_v28, 3  ;;  %vm480_vm10 = vcmp.lt.s32.totalorder %v458_v28, 4  ;;  %v420_v5 = vshll.u32 %v419_v22, 23 }
 0x13d   : > { %v1852_v4 = vsub.s32 %v711_v9, %v714_v30  ;;  %v461_v1 = vshrl.u32 %v1561_v47, %v460_v2  ;;  %v485_v6 = vsel %vm477_vm7, %v464_v48, %v467_v52  ;;  %v486_v40 = vsel %vm480_vm10, %v473_v54, 920167782 }
 0x13e   : > { %v628_v36 = vand.u32 2147483647, %v627_v63  ;;  %v415_v7 = vshll.u32 %v1800_v21, %v1830_v49  ;;  %v487_v11 = vsel %vm479_vm9, %v470_v61, %v486_v40  ;;  %v416_v14 = vshrl.u32 %v398_v59, %v414_v42 }
 0x13f   : > { %v717_v8 = vsub.s32 0, %v1852_v4  ;;  %v482_v17 = vsel %vm480_vm10, %v470_v61, 2102212464  ;;  %v489_v9 = vsel %vm477_vm7, %v467_v52, %v470_v61  ;;  %v490_v23 = vsel %vm480_vm10, %v476_v62, 1326507024 }
 0x140   : > { %v488_v2 = vsel %vm478_vm8, %v485_v6, %v487_v11  ;;  %v491_v33 = vsel %vm479_vm9, %v473_v54, %v490_v23  ;;  %v493_v45 = vshll.u32 %v453_v10, 8  ;;  %v421_v26 = vor.u32 4788187, %v420_v5 }
 0x141   : > { %v1318_v31 = vmin.u32 %v717_v8, %v1852_v4  ;;  %v481_v27 = vsel %vm477_vm7, %v461_v1, %v464_v48  ;;  %v492_v21 = vsel %vm478_vm8, %v489_v9, %v491_v33  ;;  %v963_v49 = vand.u32 2139095040, %v1684_v34 }
 0x142   : > { %v483_v59 = vsel %vm479_vm9, %v467_v52, %v482_v17  ;;  %v1868_v39 = vmul.u32.u64.low %v493_v45, %v492_v21  ;;  %v1869_v19 = vmul.u32.u64.high %v493_v45, %v492_v21, %v1868_v39  ;;  %v630_v22 = vcvt.s32.f32 %v623_v50 }
 0x143   : > { %v719_v29 = vclz %v1318_v31  ;;  %v1871_v44 = vmul.u32.u64.low %v493_v45, %v488_v2  ;;  %v1872_v56 = vmul.u32.u64.high %v493_v45, %v488_v2, %v1871_v44  ;;  %vm550_vm11 = vcmp.lt.s32.totalorder %v1666_v12, 0 }
 0x144   : > { %v417_v10 = vor.u32 %v416_v14, %v415_v7  ;;  %v964_v48 = vshrl.u32 %v963_v49, 23  ;;  %v631_v60 = vmul.f32 %v630_v22, %v628_v36  ;;  %v635_v52 = vsel %vm550_vm11, %v634_v20, %v1768_v24 }
 0x145   : > { %v1319_v54 = vadd.s32 4294967294, %v719_v29  ;;  %v422_v63 = vand.u32 2147483647, %v421_v26  ;;  %v484_v30 = vsel %vm478_vm8, %v481_v27, %v483_v59  ;;  %vm502_vm13 = vc.u32 %v1869_v19, %v1871_v44 }
 0x146   : > { %v960_v61 = vand.u32 2147483647, %v1684_v34  ;;  %v1329_v42 = vadd.s32 4294967169, %v964_v48  ;;  %vm1887_vm14 = vcmp.le.f32.partialorder %v548_v13, 0.7853982  ;;  %v503_v50 = vadd.s32 1, %v1872_v56 }
 0x147   : > { %vm1320_vm12 = vcmp.lt.s32.totalorder %v1319_v54, 0  ;;  %v424_v5 = vcvt.s32.f32 %v417_v10  ;;  %v500_v20 = vmul.u32 %v493_v45, %v484_v30  ;;  %v632_v1 = vxor.u32 2147483648, %v631_v60 }
 0x148   : > { %v1892_v24 = vsel %vm1320_vm12, 0, %v1319_v54  ;;  %v970_v28 = vadd.s32 1, %v1329_v42  ;;  %v637_v6 = vsel %vm1887_vm14, 0, %v635_v52  ;;  %v504_v40 = vsel %vm502_vm13, %v503_v50, %v1872_v56 }
 0x149   : > { %v1897_v36 = vmul.f32 %v424_v5, %v422_v63  ;;  %v505_v7 = vadd.s32 %v504_v40, %v500_v20  ;;  %v967_v13 = vand.u32 8388607, %v960_v61  ;;  %v727_v8 = vsub.s32 4294967266, %v1892_v24 }
 0x14a   : > { %vm971_vm15 = vcmp.gt.s32.totalorder %v970_v28, 0  ;;  %v1902_v14 = vand.u32 3, %v637_v6  ;;  %v1906_v9 = vsel %vm550_vm11, %v632_v1, %v631_v60  ;;  %v707_v23 = vadd.s32 %v1817_v58, %v1814_v43 }
 0x14b   : > { %v972_v11 = vsel %vm971_vm15, %v970_v28, 0  ;;  %v506_v17 = vadd.s32 536870912, %v505_v7  ;;  %v737_v31 = vsub.s32 4, %v1844_v46  ;;  %v426_v33 = vxor.u32 2147483648, %v1897_v36 }
 0x14c   : > { %v974_v2 = vand.u32 31, %v972_v11  ;;  %v968_v26 = vor.u32 8388608, %v967_v13  ;;  %v754_v27 = vand.u32 2147483647, %v1686_v35  ;;  %v723_v21 = vsub.s32 32, %v1892_v24 }
 0x14d   : > { %v1912_v45 = vshrl.u32 %v506_v17, 30  ;;  %v728_v49 = vadd.s32 127, %v727_v8  ;;  %v757_v59 = vand.u32 2139095040, %v1686_v35  ;;  %v973_v22 = vshrl.u32 %v972_v11, 5 }
 0x14e   : > { %v975_v29 = vsub.s32 32, %v974_v2  ;;  %v977_v43 = vshll.u32 %v1561_v47, %v974_v2  ;;  %v980_v58 = vshll.u32 %v1562_v51, %v974_v2  ;;  %v983_v54 = vshll.u32 %v1563_v53, %v974_v2 }
 0x14f   : > { %v508_v39 = vshll.u32 %v1912_v45, 30  ;;  %v986_v52 = vshll.u32 %v1564_v55, %v974_v2  ;;  %v1928_v30 = vshll.u32 %v968_v26, 8  ;;  %v758_v20 = vshrl.u32 %v757_v59, 23 }
 0x150   : > { %v978_v56 = vshrl.u32 %v1562_v51, %v975_v29  ;;  %v981_v10 = vshrl.u32 %v1563_v53, %v975_v29  ;;  %v984_v48 = vshrl.u32 %v1564_v55, %v975_v29  ;;  %v987_v63 = vshrl.u32 %v1565_v57, %v975_v29 }
 0x151   : > { %v1924_v60 = vsub.s32 %v505_v7, %v508_v39  ;;  %v989_v6 = vshll.u32 %v1565_v57, %v974_v2  ;;  %v990_v40 = vshrl.u32 %v1566_v0, %v975_v29  ;;  %vm344_vm0 = vcmp.lt.s32.totalorder %v1670_v15, 0 }
 0x152   : > { %v979_v42 = vor.u32 %v978_v56, %v977_v43  ;;  %v982_v50 = vor.u32 %v981_v10, %v980_v58  ;;  %v985_v5 = vor.u32 %v984_v48, %v983_v54  ;;  %v988_v1 = vor.u32 %v987_v63, %v986_v52 }
 0x153   : > { %v511_v28 = vsub.s32 0, %v1924_v60  ;;  %vm653_vm1 = vcmp.lt.s32.totalorder %v1674_v18, 0  ;;  %v725_v7 = vshrl.u32 %v707_v23, %v723_v21  ;;  %v729_v13 = vshll.u32 %v728_v49, 23 }
 0x154   : > { %vm992_vm2 = vcmp.lt.s32.totalorder %v973_v22, 1  ;;  %vm995_vm3 = vcmp.lt.s32.totalorder %v973_v22, 4  ;;  %v976_v11 = vshrl.u32 %v1561_v47, %v975_v29  ;;  %v991_v17 = vor.u32 %v990_v40, %v989_v6 }
 0x155   : > { %v1310_v8 = vmin.u32 %v511_v28, %v1924_v60  ;;  %v997_v26 = vsel %vm995_vm3, %v985_v5, 2102212464  ;;  %vm994_vm4 = vcmp.lt.s32.totalorder %v973_v22, 3  ;;  %v1000_v2 = vsel %vm992_vm2, %v979_v42, %v982_v50 }
 0x156   : > { %v1001_v59 = vsel %vm995_vm3, %v988_v1, 920167782  ;;  %v1321_v39 = vadd.s32 4294967169, %v758_v20  ;;  %vm993_vm5 = vcmp.lt.s32.totalorder %v973_v22, 2  ;;  %v996_v23 = vsel %vm992_vm2, %v976_v11, %v979_v42 }
 0x157   : > { %v513_v43 = vclz %v1310_v8  ;;  %v1002_v21 = vsel %vm994_vm4, %v985_v5, %v1001_v59  ;;  %vm1943_vm6 = vcmp.le.f32.partialorder %v342_v16, 0.7853982  ;;  %vm1949_vm7 = vcmp.le.f32.partialorder %v651_v32, 0.7853982 }
 0x158   : > { %v998_v58 = vsel %vm994_vm4, %v982_v50, %v997_v26  ;;  %v1003_v56 = vsel %vm993_vm5, %v1000_v2, %v1002_v21  ;;  %v1004_v10 = vsel %vm992_vm2, %v982_v50, %v985_v5  ;;  %v1005_v54 = vsel %vm995_vm3, %v991_v17, 1326507024 }
 0x159   : > { %v1311_v48 = vadd.s32 4294967294, %v513_v43  ;;  %v1006_v52 = vsel %vm994_vm4, %v988_v1, %v1005_v54  ;;  %v1957_v16 = vmul.u32.u64.low %v1928_v30, %v1003_v56  ;;  %v1958_v63 = vmul.u32.u64.high %v1928_v30, %v1003_v56, %v1957_v16 }
 0x15a   : > { %v724_v32 = vshll.u32 %v1852_v4, %v1892_v24  ;;  %v730_v42 = vor.u32 4788187, %v729_v13  ;;  %v1007_v20 = vsel %vm993_vm5, %v1004_v10, %v1006_v52  ;;  %v764_v28 = vadd.s32 1, %v1321_v39 }
 0x15b   : > { %v428_v6 = vsub.s32 4, %v1793_v3  ;;  %vm1312_vm8 = vcmp.lt.s32.totalorder %v1311_v48, 0  ;;  %v1966_v50 = vmul.u32.u64.low %v1928_v30, %v1007_v20  ;;  %v1967_v5 = vmul.u32.u64.high %v1928_v30, %v1007_v20, %v1966_v50 }
 0x15c   : > { %v726_v1 = vor.u32 %v725_v7, %v724_v32  ;;  %v1969_v40 = vsel %vm1312_vm8, 0, %v1311_v48  ;;  %v999_v8 = vsel %vm993_vm5, %v996_v23, %v998_v58  ;;  %vm765_vm9 = vcmp.gt.s32.totalorder %v764_v28, 0 }
 0x15d   : > { %v636_v4 = vsel %vm1887_vm14, %v1666_v12, %v1906_v9  ;;  %v427_v24 = vsel %vm344_vm0, %v426_v33, %v1897_v36  ;;  %v1986_v7 = vsel %vm653_vm1, %v737_v31, %v1844_v46  ;;  %v1018_v22 = vadd.s32 1, %v1958_v63 }
 0x15e   : > { %v731_v13 = vand.u32 2147483647, %v730_v42  ;;  %v521_v11 = vsub.s32 4294967266, %v1969_v40  ;;  %v761_v62 = vand.u32 8388607, %v754_v27  ;;  %v766_v9 = vsel %vm765_vm9, %v764_v28, 0 }
 0x15f   : > { %v1995_v36 = vsel %vm344_vm0, %v428_v6, %v1793_v3  ;;  %v1015_v33 = vmul.u32 %v1928_v30, %v999_v8  ;;  %vm1017_vm10 = vc.u32 %v1967_v5, %v1957_v16  ;;  %v1066_v46 = vand.u32 2139095040, %v1688_v37 }
 0x160   : > { %1464 = vcosq.f32 %v636_v4  ;;  %v733_v31 = vcvt.s32.f32 %v726_v1  ;;  %v1019_v17 = vsel %vm1017_vm10, %v1018_v22, %v1958_v63  ;;  %v768_v26 = vand.u32 31, %v766_v9 }
 0x161   : > { %1466 = vsinq.f32 %v636_v4  ;;  %v2005_v2 = vsel %vm1943_vm6, %v1670_v15, %v427_v24  ;;  %v740_v3 = vsel %vm1949_vm7, 0, %v1986_v7  ;;  %v1020_v30 = vadd.s32 %v1019_v17, %v1015_v33 }
 0x162   : > { %v2010_v59 = vmul.f32 %v733_v31, %v731_v13  ;;  %v522_v39 = vadd.s32 127, %v521_v11  ;;  %v762_v43 = vor.u32 8388608, %v761_v62  ;;  %v769_v23 = vsub.s32 32, %v768_v26 }
 0x163   : > { %v517_v21 = vsub.s32 32, %v1969_v40  ;;  %v1021_v58 = vadd.s32 536870912, %v1020_v30  ;;  %v767_v56 = vshrl.u32 %v766_v9, 5  ;;  %v1067_v10 = vshrl.u32 %v1066_v46, 23 }
 0x164   : > { %v771_v54 = vshll.u32 %v1561_v47, %v768_v26  ;;  %v772_v48 = vshrl.u32 %v1562_v51, %v769_v23  ;;  %v775_v52 = vshrl.u32 %v1563_v53, %v769_v23  ;;  %v778_v63 = vshrl.u32 %v1564_v55, %v769_v23 }
 0x165   : > { %v2017_v32 = vshrl.u32 %v1021_v58, 30  ;;  %v774_v42 = vshll.u32 %v1562_v51, %v768_v26  ;;  %v777_v20 = vshll.u32 %v1563_v53, %v768_v26  ;;  %v781_v28 = vshrl.u32 %v1565_v57, %v769_v23 }
 0x166   : > { %v523_v6 = vshll.u32 %v522_v39, 23  ;;  %v780_v50 = vshll.u32 %v1564_v55, %v768_v26  ;;  %v783_v1 = vshll.u32 %v1565_v57, %v768_v26  ;;  %v784_v8 = vshrl.u32 %v1566_v0, %v769_v23 }
 0x167   : > { %v1023_v4 = vshll.u32 %v2017_v32, 30  ;;  %v773_v24 = vor.u32 %v772_v48, %v771_v54  ;;  %v776_v7 = vor.u32 %v775_v52, %v774_v42  ;;  %v779_v22 = vor.u32 %v778_v63, %v777_v20 }
 0x168   : > { %v501_v13 = vadd.s32 %v1871_v44, %v1869_v19  ;;  %v782_v11 = vor.u32 %v781_v28, %v780_v50  ;;  %v802_v62 = vshll.u32 %v762_v43, 8  ;;  %v1063_v9 = vand.u32 2147483647, %v1688_v37 }
 0x169   : > { %v735_v33 = vxor.u32 2147483648, %v2010_v59  ;;  %v518_v46 = vshll.u32 %v1924_v60, %v1969_v40  ;;  %v2032_v31 = vsub.s32 %v1020_v30, %v1023_v4  ;;  %v785_v17 = vor.u32 %v784_v8, %v783_v1 }
 0x16a   : > { %v2034_v26 = vpop.eup %1464  ;;  %v519_v39 = vshrl.u32 %v501_v13, %v517_v21  ;;  %vm786_vm11 = vcmp.lt.s32.totalorder %v767_v56, 1  ;;  %vm789_vm12 = vcmp.lt.s32.totalorder %v767_v56, 4  ;;  %v1333_v58 = vadd.s32 4294967169, %v1067_v10 }
 0x16b   : > { %v2036_v54 = vpop.eup %1466  ;;  %v524_v19 = vor.u32 4788187, %v523_v6  ;;  %v1026_v44 = vsub.s32 0, %v2032_v31  ;;  %v791_v43 = vsel %vm789_vm12, %v779_v22, 2102212464  ;;  %v794_v48 = vsel %vm786_vm11, %v773_v24, %v776_v7 }
 0x16c   : > { %v770_v52 = vshrl.u32 %v1561_v47, %v769_v23  ;;  %vm788_vm13 = vcmp.lt.s32.totalorder %v767_v56, 3  ;;  %v795_v60 = vsel %vm789_vm12, %v782_v11, 920167782  ;;  %v798_v40 = vsel %vm786_vm11, %v776_v7, %v779_v22 }
 0x16d   : > { %v1330_v30 = vmin.u32 %v1026_v44, %v2032_v31  ;;  %vm787_vm14 = vcmp.lt.s32.totalorder %v767_v56, 2  ;;  %v796_v21 = vsel %vm788_vm13, %v779_v22, %v795_v60  ;;  %v799_v63 = vsel %vm789_vm12, %v785_v17, 1326507024 }
 0x16e   : > { %v790_v10 = vsel %vm786_vm11, %v770_v52, %v773_v24  ;;  %v792_v42 = vsel %vm788_vm13, %v776_v7, %v791_v43  ;;  %v797_v20 = vsel %vm787_vm14, %v794_v48, %v796_v21  ;;  %v800_v28 = vsel %vm788_vm13, %v782_v11, %v799_v63 }
 0x16f   : > { %v1028_v6 = vclz %v1330_v30  ;;  %v801_v50 = vsel %vm787_vm14, %v798_v40, %v800_v28  ;;  %v2046_v1 = vmul.u32.u64.low %v802_v62, %v797_v20  ;;  %v2047_v23 = vmul.u32.u64.high %v802_v62, %v797_v20, %v2046_v1 }
 0x170   : > { %v2050_v8 = vand.u32 3, %v740_v3  ;;  %v2052_v4 = vmul.u32.u64.low %v802_v62, %v801_v50  ;;  %v2053_v13 = vmul.u32.u64.high %v802_v62, %v801_v50, %v2052_v4  ;;  %v1073_v22 = vadd.s32 1, %v1333_v58 }
 0x171   : > { %1468 = vsinq.f32 %v2005_v2  ;;  %v520_v24 = vor.u32 %v519_v39, %v518_v46  ;;  %v1331_v7 = vadd.s32 4294967294, %v1028_v6  ;;  %v793_v17 = vsel %vm787_vm14, %v790_v10, %v792_v42 }
 0x172   : > { %v736_v11 = vsel %vm653_vm1, %v735_v33, %v2010_v59  ;;  %v1070_v44 = vand.u32 8388607, %v1063_v9  ;;  %vm1074_vm15 = vcmp.gt.s32.totalorder %v1073_v22, 0  ;;  %v525_v3 = vand.u32 2147483647, %v524_v19 }
 0x173   : > { %vm1332_vm0 = vcmp.lt.s32.totalorder %v1331_v7, 0  ;;  %v812_v43 = vadd.s32 1, %v2047_v23  ;;  %v1075_v48 = vsel %vm1074_vm15, %v1073_v22, 0  ;;  %v1567_v58 = vmov 0.0  }
 0x174   : > { %1364 = vmatprep.subr.bf16.mxu1 %v1567_v58  ;;  %v531_v46 = vsub.s32 4, %v1912_v45  ;;  %v1031_v56 = vsel %vm1332_vm0, 0, %v1331_v7  ;;  %v809_v39 = vmul.u32 %v802_v62, %v793_v17  ;;  %vm811_vm2 = vc.u32 %v2053_v13, %v2046_v1 }
 0x175   : > { %v527_v59 = vcvt.s32.f32 %v520_v24  ;;  %v1032_v33 = vsub.s32 32, %v1031_v56  ;;  %v1036_v52 = vsub.s32 4294967266, %v1031_v56  ;;  %v813_v60 = vsel %vm811_vm2, %v812_v43, %v2047_v23 }
 0x176   : > { %v2071_v19 = vsel %vm1949_vm7, %v1674_v18, %v736_v11  ;;  %v814_v40 = vadd.s32 %v813_v60, %v809_v39  ;;  %v1071_v30 = vor.u32 8388608, %v1070_v44  ;;  %v1077_v21 = vand.u32 31, %v1075_v48 }
 0x177   : > { %v528_v63 = vmul.f32 %v527_v59, %v525_v3  ;;  %v1016_v62 = vadd.s32 %v1957_v16, %v1967_v5  ;;  %v1037_v10 = vadd.s32 127, %v1036_v52  ;;  %v860_v42 = vand.u32 2139095040, %v1690_v41 }
 0x178   : > { %v1033_v20 = vshll.u32 %v2032_v31, %v1031_v56  ;;  %v815_v28 = vadd.s32 536870912, %v814_v40  ;;  %v2077_v6 = vshrl.u32 %v1075_v48, 5  ;;  %v1078_v50 = vsub.s32 32, %v1077_v21 }
 0x179   : > { %v1034_v23 = vshrl.u32 %v1016_v62, %v1032_v33  ;;  %v1038_v29 = vshll.u32 %v1037_v10, 23  ;;  %v1080_v4 = vshll.u32 %v1561_v47, %v1077_v21  ;;  %v1083_v22 = vshll.u32 %v1562_v51, %v1077_v21 }
 0x17a   : > { %v2081_v24 = vshrl.u32 %v815_v28, 30  ;;  %v1081_v7 = vshrl.u32 %v1562_v51, %v1078_v50  ;;  %v1084_v16 = vshrl.u32 %v1563_v53, %v1078_v50  ;;  %v1086_v5 = vshll.u32 %v1563_v53, %v1077_v21 }
 0x17b   : > { %v2086_v17 = vpop.eup %1468  ;;  %vm447_vm1 = vcmp.lt.s32.totalorder %v1681_v25, 0  ;;  %v1039_v31 = vor.u32 4788187, %v1038_v29  ;;  %v1087_v11 = vshrl.u32 %v1564_v55, %v1078_v50  ;;  %v1089_v44 = vshll.u32 %v1564_v55, %v1077_v21 }
 0x17c   : > { %v1090_v3 = vshrl.u32 %v1565_v57, %v1078_v50  ;;  %v817_v43 = vshll.u32 %v2081_v24, 30  ;;  %v1082_v48 = vor.u32 %v1081_v7, %v1080_v4  ;;  %v1085_v56 = vor.u32 %v1084_v16, %v1083_v22 }
 0x17d   : > { %v2093_v39 = vshll.u32 %v1071_v30, 8  ;;  %v529_v59 = vxor.u32 2147483648, %v528_v63  ;;  %v1035_v33 = vor.u32 %v1034_v23, %v1033_v20  ;;  %v1088_v52 = vor.u32 %v1087_v11, %v1086_v5 }
 0x17e   : > { %v1091_v60 = vor.u32 %v1090_v3, %v1089_v44  ;;  %vm2097_vm3 = vcmp.le.f32.partialorder %v445_v38, 0.7853982  ;;  %v2101_v10 = vsub.s32 %v814_v40, %v817_v43  ;;  %v1092_v28 = vshll.u32 %v1565_v57, %v1077_v21 }
 0x17f   : > { %v1093_v29 = vshrl.u32 %v1566_v0, %v1078_v50  ;;  %v861_v4 = vshrl.u32 %v860_v42, 23  ;;  %v1040_v22 = vand.u32 2147483647, %v1039_v31  ;;  %vm1095_vm4 = vcmp.lt.s32.totalorder %v2077_v6, 1 }
 0x180   : > { %vm1096_vm5 = vcmp.lt.s32.totalorder %v2077_v6, 2  ;;  %vm1097_vm7 = vcmp.lt.s32.totalorder %v2077_v6, 3  ;;  %v820_v30 = vsub.s32 0, %v2101_v10  ;;  %vm1098_vm8 = vcmp.lt.s32.totalorder %v2077_v6, 4 }
 0x181   : > { %v1094_v38 = vor.u32 %v1093_v29, %v1092_v28  ;;  %v1103_v40 = vsel %vm1095_vm4, %v1082_v48, %v1085_v56  ;;  %v1042_v20 = vcvt.s32.f32 %v1035_v33  ;;  %v1079_v21 = vshrl.u32 %v1561_v47, %v1078_v50 }
 0x182   : > { %v1104_v23 = vsel %vm1098_vm8, %v1091_v60, 920167782  ;;  %v1107_v42 = vsel %vm1095_vm4, %v1085_v56, %v1088_v52  ;;  %vm962_vm9 = vcmp.lt.s32.totalorder %v1684_v34, 0  ;;  %v1322_v7 = vmin.u32 %v820_v30, %v2101_v10 }
 0x183   : > { %v1100_v16 = vsel %vm1098_vm8, %v1088_v52, 2102212464  ;;  %v1105_v5 = vsel %vm1097_vm7, %v1088_v52, %v1104_v23  ;;  %v1108_v31 = vsel %vm1098_vm8, %v1094_v38, 1326507024  ;;  %v1043_v11 = vmul.f32 %v1042_v20, %v1040_v22 }
 0x184   : > { %v1106_v44 = vsel %vm1096_vm5, %v1103_v40, %v1105_v5  ;;  %v1109_v50 = vsel %vm1097_vm7, %v1091_v60, %v1108_v31  ;;  %v1325_v3 = vadd.s32 4294967169, %v861_v4  ;;  %v530_v43 = vsel %vm447_vm1, %v529_v59, %v528_v63 }
 0x185   : > { %v822_v33 = vclz %v1322_v7  ;;  %v1099_v28 = vsel %vm1095_vm4, %v1079_v21, %v1082_v48  ;;  %v1110_v29 = vsel %vm1096_vm5, %v1107_v42, %v1109_v50  ;;  %v1101_v52 = vsel %vm1097_vm7, %v1085_v56, %v1100_v16 }
 0x186   : > { %v2132_v22 = vmul.u32.u64.low %v2093_v39, %v1110_v29  ;;  %v2133_v30 = vmul.u32.u64.high %v2093_v39, %v1110_v29, %v2132_v22  ;;  %v867_v38 = vadd.s32 1, %v1325_v3  ;;  %v857_v63 = vand.u32 2147483647, %v1690_v41 }
 0x187   : > { %v1323_v60 = vadd.s32 4294967294, %v822_v33  ;;  %v2136_v4 = vmul.u32.u64.low %v2093_v39, %v1106_v44  ;;  %v2137_v40 = vmul.u32.u64.high %v2093_v39, %v1106_v44, %v2136_v4  ;;  %1470 = vcosq.f32 %v2005_v2 }
 0x188   : > { %v533_v48 = vsel %vm2097_vm3, %v1681_v25, %v530_v43  ;;  %v1044_v56 = vxor.u32 2147483648, %v1043_v11  ;;  %vm868_vm10 = vcmp.gt.s32.totalorder %v867_v38, 0  ;;  %1472 = vcosq.f32 %v2071_v19 }
 0x189   : > { %vm1324_vm11 = vcmp.lt.s32.totalorder %v1323_v60, 0  ;;  %v1102_v59 = vsel %vm1096_vm5, %v1099_v28, %v1101_v52  ;;  %v869_v20 = vsel %vm868_vm10, %v867_v38, 0  ;;  %1474 = vsinq.f32 %v2071_v19 }
 0x18a   : > { %v2154_v2 = vsel %vm447_vm1, %v531_v46, %v1912_v45  ;;  %vm2158_vm12 = vcmp.le.f32.partialorder %v960_v61, 0.7853982  ;;  %vm1120_vm13 = vc.u32 %v2133_v30, %v2136_v4  ;;  %1476 = vcosq.f32 %v533_v48 }
 0x18b   : > { %v1046_v6 = vsub.s32 4, %v2017_v32  ;;  %v1121_v19 = vadd.s32 1, %v2137_v40  ;;  %v864_v23 = vand.u32 8388607, %v857_v63  ;;  %v1045_v45 = vsel %vm962_vm9, %v1044_v56, %v1043_v11 }
 0x18c   : > { %v2170_v46 = vsel %vm1324_vm11, 0, %v1323_v60  ;;  %v1118_v61 = vmul.u32 %v2093_v39, %v1102_v59  ;;  %v871_v42 = vand.u32 31, %v869_v20  ;;  %1478 = vsinq.f32 %v533_v48 }
 0x18d   : > { %v1122_v7 = vsel %vm1120_vm13, %v1121_v19, %v2137_v40  ;;  %v431_v16 = vsel %vm1943_vm6, 0, %v1995_v36  ;;  %v438_v5 = vxor.u32 2147483648, %v2086_v17  ;;  %v2180_v31 = vadd.s32 %v2046_v1, %v2053_v13 }
 0x18e   : > { %v1123_v44 = vadd.s32 %v1122_v7, %v1118_v61  ;;  %v870_v11 = vshrl.u32 %v869_v20, 5  ;;  %v872_v50 = vsub.s32 32, %v871_v42  ;;  %v2185_v39 = vsel %vm2158_vm12, %v1684_v34, %v1045_v45 }
 0x18f   : > { %v830_v3 = vsub.s32 4294967266, %v2170_v46  ;;  %v865_v43 = vor.u32 8388608, %v864_v23  ;;  %v874_v49 = vshll.u32 %v1561_v47, %v871_v42  ;;  %v877_v28 = vshll.u32 %v1562_v51, %v871_v42 }
 0x190   : > { %v1124_v36 = vadd.s32 536870912, %v1123_v44  ;;  %v875_v33 = vshrl.u32 %v1562_v51, %v872_v50  ;;  %v878_v1 = vshrl.u32 %v1563_v53, %v872_v50  ;;  %v880_v13 = vshll.u32 %v1563_v53, %v871_v42 }
 0x191   : > { %v881_v29 = vshrl.u32 %v1564_v55, %v872_v50  ;;  %v883_v52 = vshll.u32 %v1564_v55, %v871_v42  ;;  %v884_v22 = vshrl.u32 %v1565_v57, %v872_v50  ;;  %v1471_v38 = vpop.eup %1470  ;;  %vm889_vm6 = vcmp.lt.s32.totalorder %v870_v11, 1 }
 0x192   : > { %v2196_v60 = vshrl.u32 %v1124_v36, 30  ;;  %v876_v40 = vor.u32 %v875_v33, %v874_v49  ;;  %v879_v48 = vor.u32 %v878_v1, %v877_v28  ;;  %v2198_v56 = vpop.eup %1472  ;;  %v886_v20 = vshll.u32 %v1565_v57, %v871_v42 }
 0x193   : > { %v882_v59 = vor.u32 %v881_v29, %v880_v13  ;;  %v885_v51 = vor.u32 %v884_v22, %v883_v52  ;;  %v887_v53 = vshrl.u32 %v1566_v0, %v872_v50  ;;  %v2202_v19 = vpop.eup %1474  ;;  %vm892_vm14 = vcmp.lt.s32.totalorder %v870_v11, 4 }
 0x194   : > { %v1126_v55 = vshll.u32 %v2196_v60, 30  ;;  %v897_v23 = vsel %vm889_vm6, %v876_v40, %v879_v48  ;;  %v905_v45 = vshll.u32 %v865_v43, 8  ;;  %v1477_v61 = vpop.eup %1476  ;;  %vm890_vm15 = vcmp.lt.s32.totalorder %v870_v11, 2 }
 0x195   : > { %v888_v7 = vor.u32 %v887_v53, %v886_v20  ;;  %vm891_vm0 = vcmp.lt.s32.totalorder %v870_v11, 3  ;;  %v898_v49 = vsel %vm892_vm14, %v885_v51, 920167782  ;;  %v873_v57 = vshrl.u32 %v1561_v47, %v872_v50 }
 0x196   : > { %v2207_v36 = vsub.s32 %v1123_v44, %v1126_v55  ;;  %v894_v0 = vsel %vm892_vm14, %v882_v59, 2102212464  ;;  %v899_v42 = vsel %vm891_vm0, %v882_v59, %v898_v49  ;;  %v1479_v33 = vpop.eup %1478  ;;  %v831_v28 = vadd.s32 127, %v830_v3 }
 0x197   : > { %v900_v1 = vsel %vm890_vm15, %v897_v23, %v899_v42  ;;  %v435_v13 = vand.u32 3, %v431_v16  ;;  %v441_v43 = vxor.u32 2147483648, %v1471_v38  ;;  %v893_v52 = vsel %vm889_vm6, %v873_v57, %v876_v40 }
 0x198   : > { %v1129_v29 = vsub.s32 0, %v2207_v36  ;;  %v901_v22 = vsel %vm889_vm6, %v879_v48, %v882_v59  ;;  %v902_v44 = vsel %vm892_vm14, %v888_v7, 1326507024  ;;  %v895_v47 = vsel %vm891_vm0, %v879_v48, %v894_v0 }
 0x199   : > { %v903_v50 = vsel %vm891_vm0, %v885_v51, %v902_v44  ;;  %v2219_v20 = vmul.u32.u64.low %v905_v45, %v900_v1  ;;  %v2220_v53 = vmul.u32.u64.high %v905_v45, %v900_v1, %v2219_v20  ;;  %vm434_vm2 = vweird.f32 %v1670_v15 }
 0x19a   : > { %v1334_v3 = vmin.u32 %v1129_v29, %v2207_v36  ;;  %v904_v16 = vsel %vm890_vm15, %v901_v22, %v903_v50  ;;  %v534_v40 = vsel %vm2097_vm3, 0, %v2154_v2  ;;  %vm537_vm1 = vweird.f32 %v1681_v25 }
 0x19b   : > { %v826_v48 = vsub.s32 32, %v2170_v46  ;;  %v832_v59 = vshll.u32 %v831_v28, 23  ;;  %v2231_v51 = vmul.u32.u64.low %v905_v45, %v904_v16  ;;  %v2232_v55 = vmul.u32.u64.high %v905_v45, %v904_v16, %v2231_v51 }
 0x19c   : > { %v1131_v23 = vclz %v1334_v3  ;;  %v896_v7 = vsel %vm890_vm15, %v893_v52, %v895_v47  ;;  %vm437_vm4 = vcmp.eq.s32.totalorder %v435_v13, 0  ;;  %vm440_vm5 = vcmp.eq.s32.totalorder %v435_v13, 2 }
 0x19d   : > { %v915_v49 = vadd.s32 1, %v2220_v53  ;;  %v439_v57 = vsel %vm437_vm4, %v1471_v38, %v438_v5  ;;  %v442_v62 = vsel %vm440_vm5, %v441_v43, %v2086_v17  ;;  %v538_v2 = vand.u32 3, %v534_v40 }
 0x19e   : > { %v1335_v0 = vadd.s32 4294967294, %v1131_v23  ;;  %vm436_vm3 = vcmp.lt.s32.totalorder %v435_v13, 2  ;;  %v541_v42 = vxor.u32 2147483648, %v1479_v33  ;;  %v544_v28 = vxor.u32 2147483648, %v1477_v61 }
 0x19f   : > { %v912_v1 = vmul.u32 %v905_v45, %v896_v7  ;;  %vm914_vm7 = vc.u32 %v2232_v55, %v2219_v20  ;;  %v443_v11 = vsel %vm436_vm3, %v439_v57, %v442_v62  ;;  %vm539_vm8 = vcmp.lt.s32.totalorder %v538_v2, 2 }
 0x1a0   : > { %vm1336_vm10 = vcmp.lt.s32.totalorder %v1335_v0, 0  ;;  %v916_v29 = vsel %vm914_vm7, %v915_v49, %v2220_v53  ;;  %vm540_vm11 = vcmp.eq.s32.totalorder %v538_v2, 0  ;;  %vm543_vm13 = vcmp.eq.s32.totalorder %v538_v2, 2 }
 0x1a1   : > { %v1134_v52 = vsel %vm1336_vm10, 0, %v1335_v0  ;;  %v917_v5 = vadd.s32 %v916_v29, %v912_v1  ;;  %v542_v38 = vsel %vm540_vm11, %v1477_v61, %v541_v42  ;;  %v545_v17 = vsel %vm543_vm13, %v544_v28, %v1479_v33 }
 0x1a2   : > { %v1119_v13 = vadd.s32 %v2136_v4, %v2133_v30  ;;  %v1135_v43 = vsub.s32 32, %v1134_v52  ;;  %v1139_v22 = vsub.s32 4294967266, %v1134_v52  ;;  %v546_v45 = vsel %vm539_vm8, %v542_v38, %v545_v17 }
 0x1a3   : > { %v828_v44 = vshrl.u32 %v2180_v31, %v826_v48  ;;  %v918_v47 = vadd.s32 536870912, %v917_v5  ;;  %v444_v50 = vsel %vm434_vm2, nan, %v443_v11  ;;  %v547_v53 = vsel %vm537_vm1, nan, %v546_v45 }
 0x1a4   : > { %v1136_v3 = vshll.u32 %v2207_v36, %v1134_v52  ;;  %v1137_v16 = vshrl.u32 %v1119_v13, %v1135_v43  ;;  %v1140_v61 = vadd.s32 127, %v1139_v22  ;;  %v1167_v33 = vpack.c.bf16 %v547_v53, %v444_v50 }
 0x1a5   : > { %v833_v40 = vor.u32 4788187, %v832_v59  ;;  %v2250_v51 = vshrl.u32 %v918_v47, 30  ;;  %v644_v30 = vxor.u32 2147483648, %v2036_v54  ;;  %v647_v4 = vxor.u32 2147483648, %v2034_v26 }
 0x1a6   : > { %1480 = vcosq.f32 %v2185_v39  ;;  %v827_v15 = vshll.u32 %v2101_v10, %v2170_v46  ;;  %v1138_v31 = vor.u32 %v1137_v16, %v1136_v3  ;;  %v1141_v25 = vshll.u32 %v1140_v61, 23  ;;  %1365 = vmatpush3.bf16.msra.mxu1 %v1167_v33 }
 0x1a7   : > { %1482 = vsinq.f32 %v2185_v39  ;;  %vm1065_vm6 = vcmp.lt.s32.totalorder %v1688_v37, 0  ;;  %v920_v36 = vshll.u32 %v2250_v51, 30  ;;  %1366 = vmatprep.subr.bf16.mxu1 %v1567_v58  ;;  %vm643_vm14 = vcmp.eq.s32.totalorder %v1902_v14, 0 }
 0x1a8   : > { %vm646_vm15 = vcmp.eq.s32.totalorder %v1902_v14, 2  ;;  %v829_v48 = vor.u32 %v828_v44, %v827_v15  ;;  %v1142_v59 = vor.u32 4788187, %v1141_v25  ;;  %v645_v23 = vsel %vm643_vm14, %v2034_v26, %v644_v30 }
 0x1a9   : > { %v648_v10 = vsel %vm646_vm15, %v647_v4, %v2036_v54  ;;  %v834_v46 = vand.u32 2147483647, %v833_v40  ;;  %v921_v7 = vsub.s32 %v917_v5, %v920_v36  ;;  %vm642_vm0 = vcmp.lt.s32.totalorder %v1902_v14, 2 }
 0x1aa   : > { %v747_v39 = vxor.u32 2147483648, %v2202_v19  ;;  %v1143_v49 = vand.u32 2147483647, %v1142_v59  ;;  %v1145_v57 = vcvt.s32.f32 %v1138_v31  ;;  %vm746_vm2 = vcmp.eq.s32.totalorder %v2050_v8, 0 }
 0x1ab   : > { %v750_v62 = vxor.u32 2147483648, %v2198_v56  ;;  %v923_v2 = vsub.s32 0, %v921_v7  ;;  %v649_v0 = vsel %vm642_vm0, %v645_v23, %v648_v10  ;;  %vm749_vm1 = vcmp.eq.s32.totalorder %v2050_v8, 2 }
 0x1ac   : > { %v748_v42 = vsel %vm746_vm2, %v2198_v56, %v747_v39  ;;  %v836_v26 = vcvt.s32.f32 %v829_v48  ;;  %v1146_v54 = vmul.f32 %v1145_v57, %v1143_v49  ;;  %vm745_vm4 = vcmp.lt.s32.totalorder %v2050_v8, 2 }
 0x1ad   : > { %v751_v14 = vsel %vm749_vm1, %v750_v62, %v2202_v19  ;;  %v1326_v28 = vmin.u32 %v923_v2, %v921_v7  ;;  %vm640_vm5 = vweird.f32 %v1666_v12  ;;  %vm743_vm3 = vweird.f32 %v1674_v18 }
 0x1ae   : > { %v752_v1 = vsel %vm745_vm4, %v748_v42, %v751_v14  ;;  %v1047_v56 = vsel %vm962_vm9, %v1046_v6, %v2017_v32  ;;  %v1147_v11 = vxor.u32 2147483648, %v1146_v54  ;;  %v650_v29 = vsel %vm640_vm5, nan, %v649_v0 }
 0x1af   : > { %v753_v52 = vsel %vm743_vm3, nan, %v752_v1  ;;  %v837_v5 = vmul.f32 %v836_v26, %v834_v46  ;;  %v1149_v8 = vsub.s32 4, %v2196_v60  ;;  %v925_v38 = vclz %v1326_v28 }
 0x1b0   : > { %v1168_v19 = vpack.c.bf16 %v753_v52, %v650_v29  ;;  %v1481_v17 = vpop.eup %1480  ;;  %vm2283_vm7 = vcmp.le.f32.partialorder %v1063_v9, 0.7853982  ;;  %v1148_v18 = vsel %vm1065_vm6, %v1147_v11, %v1146_v54  ;;  %v1049_v43 = vsel %vm2158_vm12, 0, %v1047_v56 }
 0x1b1   : > { %v1483_v13 = vpop.eup %1482  ;;  %v1151_v32 = vsel %vm2283_vm7, %v1688_v37, %v1148_v18  ;;  %v1327_v6 = vadd.s32 4294967294, %v925_v38  ;;  %v838_v9 = vxor.u32 2147483648, %v837_v5  ;;  %v1150_v22 = vsel %vm1065_vm6, %v1149_v8, %v2196_v60 }
 0x1b2   : > { %1367 = vmatpush3.bf16.msra.mxu1 %v1168_v19  ;;  %1484 = vcosq.f32 %v1151_v32  ;;  %v913_v44 = vadd.s32 %v2219_v20, %v2232_v55  ;;  %v1053_v53 = vand.u32 3, %v1049_v43  ;;  %vm756_vm8 = vcmp.lt.s32.totalorder %v1686_v35, 0 }
 0x1b3   : > { %1368 = vmatprep.subr.bf16.mxu1 %v1567_v58  ;;  %1486 = vsinq.f32 %v1151_v32  ;;  %vm1328_vm9 = vcmp.lt.s32.totalorder %v1327_v6, 0  ;;  %v1152_v21 = vsel %vm2283_vm7, 0, %v1150_v22  ;;  %v839_v3 = vsel %vm756_vm8, %v838_v9, %v837_v5 }
 0x1b4   : > { %v928_v45 = vsel %vm1328_vm9, 0, %v1327_v6  ;;  %vm1568_vm12 = vmmov 0   ;;  %v1056_v33 = vxor.u32 2147483648, %v1483_v13  ;;  %v1059_v40 = vxor.u32 2147483648, %v1481_v17 }
 0x1b5   : > { %v929_v47 = vsub.s32 32, %v928_v45  ;;  %v933_v50 = vsub.s32 4294967266, %v928_v45  ;;  %v930_v16 = vshll.u32 %v921_v7, %v928_v45  ;;  %1372 = vmatprep.mubr.msk.bf16.mxu1 %vm1568_vm12, %v1567_v58  ;;  %vm2308_vm10 = vcmp.le.f32.partialorder %v754_v27, 0.7853982 }
 0x1b6   : > { %v842_v4 = vsel %vm2308_vm10, %v1686_v35, %v839_v3  ;;  %v1156_v15 = vand.u32 3, %v1152_v21  ;;  %vm1055_vm11 = vcmp.eq.s32.totalorder %v1053_v53, 0  ;;  %vm1058_vm13 = vcmp.eq.s32.totalorder %v1053_v53, 2 }
 0x1b7   : > { %v931_v61 = vshrl.u32 %v913_v44, %v929_v47  ;;  %v934_v60 = vadd.s32 127, %v933_v50  ;;  %v1057_v36 = vsel %vm1055_vm11, %v1481_v17, %v1056_v33  ;;  %v1060_v48 = vsel %vm1058_vm13, %v1059_v40, %v1483_v13  ;;  %v1166_v47 = vld [vmem:[%s2395_s2] sm:$0x1] }
 0x1b8   : > { %1488 = vcosq.f32 %v842_v4  ;;  %vm1054_vm6 = vcmp.lt.s32.totalorder %v1053_v53, 2  ;;  %vm1161_vm14 = vcmp.eq.s32.totalorder %v1156_v15, 2  ;;  %vm1158_vm15 = vcmp.eq.s32.totalorder %v1156_v15, 0 }
 0x1b9   : > { %v932_v55 = vor.u32 %v931_v61, %v930_v16  ;;  %v935_v30 = vshll.u32 %v934_v60, 23  ;;  %1490 = vsinq.f32 %v842_v4  ;;  %v1061_v39 = vsel %vm1054_vm6, %v1057_v36, %v1060_v48 }
 0x1ba   : > { %v840_v57 = vsub.s32 4, %v2081_v24  ;;  %vm1157_vm0 = vcmp.lt.s32.totalorder %v1156_v15, 2  ;;  %vm1052_vm2 = vweird.f32 %v1684_v34  ;;  %vm1155_vm1 = vweird.f32 %v1688_v37 }
 0x1bb   : > { %v936_v31 = vor.u32 4788187, %v935_v30  ;;  %v939_v27 = vcvt.s32.f32 %v932_v55  ;;  %vm859_vm4 = vcmp.lt.s32.totalorder %v1690_v41, 0  ;;  %v1062_v42 = vsel %vm1052_vm2, nan, %v1061_v39 }
 0x1bc   : > { %v1485_v25 = vpop.eup %1484  ;;  %vm2321_vm5 = vcmp.le.f32.partialorder %v857_v63, 0.7853982  ;;  %v943_v28 = vsub.s32 4, %v2250_v51  ;;  %v841_v34 = vsel %vm756_vm8, %v840_v57, %v2081_v24  ;;  %vm949_vm11 = vweird.f32 %v1690_v41 }
 0x1bd   : > { %v1487_v59 = vpop.eup %1486  ;;  %v937_v23 = vand.u32 2147483647, %v936_v31  ;;  %v1162_v10 = vxor.u32 2147483648, %v1485_v25  ;;  %v843_v63 = vsel %vm2308_vm10, 0, %v841_v34  ;;  %vm846_vm13 = vweird.f32 %v1686_v35 }
 0x1be   : > { %v1159_v46 = vxor.u32 2147483648, %v1487_v59  ;;  %v944_v11 = vsel %vm859_vm4, %v943_v28, %v2250_v51  ;;  %v847_v52 = vand.u32 3, %v843_v63  ;;  %vm1171_vm6 = vcmask 523264  }
 0x1bf   : > { %v940_v7 = vmul.f32 %v939_v27, %v937_v23  ;;  %v1163_v49 = vsel %vm1161_vm14, %v1162_v10, %v1487_v59  ;;  %v946_v5 = vsel %vm2321_vm5, 0, %v944_v11 }
 0x1c0   : > { %v1160_v62 = vsel %vm1158_vm15, %v1485_v25, %v1159_v46  ;;  %v950_v24 = vand.u32 3, %v946_v5  ;;  %vm849_vm3 = vcmp.eq.s32.totalorder %v847_v52, 0  ;;  %vm852_vm7 = vcmp.eq.s32.totalorder %v847_v52, 2 }
 0x1c1   : > { %v941_v2 = vxor.u32 2147483648, %v940_v7  ;;  %v1164_v0 = vsel %vm1157_vm0, %v1160_v62, %v1163_v49  ;;  %vm848_vm9 = vcmp.lt.s32.totalorder %v847_v52, 2 }
 0x1c2   : > { %v1165_v26 = vsel %vm1155_vm1, nan, %v1164_v0  ;;  %v1489_v56 = vpop.eup %1488  ;;  %vm955_vm8 = vcmp.eq.s32.totalorder %v950_v24, 2  ;;  %vm952_vm12 = vcmp.eq.s32.totalorder %v950_v24, 0  ;;  %vm951_vm10 = vcmp.lt.s32.totalorder %v950_v24, 2 }
 0x1c3   : > { %v942_v14 = vsel %vm859_vm4, %v941_v2, %v940_v7  ;;  %v1170_v1 = vpack.c.bf16 %v1165_v26, %v1062_v42  ;;  %v1491_v29 = vpop.eup %1490  ;;  %v853_v38 = vxor.u32 2147483648, %v1489_v56 }
 0x1c4   : > { %v945_v37 = vsel %vm2321_vm5, %v1690_v41, %v942_v14  ;;  %v850_v8 = vxor.u32 2147483648, %v1491_v29 }
 0x1c5   : > { %1492 = vcosq.f32 %v945_v37  ;;  %v854_v12 = vsel %vm852_vm7, %v853_v38, %v1491_v29 }
 0x1c6   : > { %1494 = vsinq.f32 %v945_v37  ;;  %v851_v17 = vsel %vm849_vm3, %v1489_v56, %v850_v8 }
 0x1c7   : > { %v855_v6 = vsel %vm848_vm9, %v851_v17, %v854_v12 }
 0x1c8   : > { %v856_v22 = vsel %vm846_vm13, nan, %v855_v6 }
 0x1cf   : > { %v1493_v19 = vpop.eup %1492 }
 0x1d0   : > { %v1495_v18 = vpop.eup %1494  ;;  %v956_v13 = vxor.u32 2147483648, %v1493_v19 }
 0x1d1   : > { %v953_v32 = vxor.u32 2147483648, %v1495_v18 }
 0x1d2   : > { %v957_v51 = vsel %vm955_vm8, %v956_v13, %v1495_v18 }
 0x1d3   : > { %v954_v43 = vsel %vm952_vm12, %v1493_v19, %v953_v32 }
 0x1d4   : > { %v958_v9 = vsel %vm951_vm10, %v954_v43, %v957_v51 }
 0x1d5   : > { %v959_v45 = vsel %vm949_vm11, nan, %v958_v9 }
 0x1d6   : > { %v1169_v44 = vpack.c.bf16 %v959_v45, %v856_v22 }
 0x1d8   : > { %1369 = vmatpush3.bf16.msra.mxu1 %v1169_v44 }
 0x1d9   : > { %1370 = vmatprep.subr.bf16.mxu1 %v1567_v58 }
 0x1dc   : > { %1371 = vmatpush3.bf16.msra.mxu1 %v1170_v1 }
 0x1df   : > { %1373 = vmatmul.mubr.msk.bf16.vlgmr.msra.gmra.mrb[0].mxu1 %vm1171_vm6, %v1166_v47 }
 0x2b2   : > { %v1209_v35 = vpop.f32.mrb[0].mxu1 }
 0x2b3   : > { %1215 = vst [vmem:[%s216_s26] sm:$0x1] %v1209_v35  ;;  %v1374_v41 = vpop.f32.mrb[1].mxu1 }
 0x2b4   : > { %v1212_v58 = vpop.f32.mrb[2].mxu1 }
 0x2b5   : > { %1509 = shalt.err (!%p1506_p5)
}
 0x2b6   : > { %s1510_s4 = scalar_lea.hbm %s2351_s5, 16  ;;  %s1514_s17 = scalar_lea.hbm %s2396_s3, 32 }
 0x2b7   : > { %p1511_p7 = scmp.ne.s32.totalorder %s2351_s5, %s1510_s4  ;;  %p1515_p12 = scmp.lt.u32.totalorder %s2351_s5, %s2396_s3 }
 0x2b8   : > { %p1516_p13 = scmp.lt.u32.totalorder %s1514_s17, %s1510_s4  ;;  %p1518_p1 = scmp.lt.u32.totalorder %s1510_s4, %s2351_s5 }
 0x2b9   : > { %p1512_p10 = pnand %p1511_p7, %p1628_p6 }
 0x2ba   : > { %p1517_p0 = por %p1516_p13, %p1515_p12 }
 0x2bb   : > { %p1513_p11 = pneg %p1512_p10 }
 0x2bc   : > { %p1519_p2 = por %p1518_p1, %p1517_p0 }
 0x2be   : > { %p1520_p3 = pnand %p1519_p2, %p1513_p11 }
 0x2c0   : > { %1523 = shalt.err (!%p1520_p3)
}
 0x2c1   : > { %1410 = dma.vmem_to_hbm [thread:$0]  (%p1628_p6), %s2346_s27, 16, %s2351_s5, %s1217_s6   ;;  %v1375_v50 = vpop.f32.mrb[3].mxu1 }
 0x2c2 PF: > { %s1241_s24 = sand.u32 1, %s1546_s12   ;;  %p1413_p4 = pnand %p1292_p9, %p1632_p8 }
 0x2c3   : > { %s1242_s25 = scalar_lea.sflag [#allocation4], %s1241_s24 }
 0x2c4   : > { %1541 = dma.done.wait (!%p1413_p4), %s1242_s25, 16  }
 0x2c5   : > { %1543 = vsyncadd (!%p1413_p4), %s1242_s25, 4294967280  ;;  %p13_p5 = scmp.ge.s32.totalorder %s1613_s18, 4   ;;  %s2415_s12 = smov %s1550_s13 }
 0x2c6   : > { %s2416_s13 = smov %s1554_s14  ;;  %s2417_s14 = smov %s1626_s21 }
 0x2c7   : > { %s2418_s15 = smov %s1613_s18  ;;  %15 = sbr.rel (!%p13_p5) target bundleno = 3 (0x3), region = 113 }
 0x2ce   :  { %1246 = vsyncpa [#allocation4], 1 }
 0x2cf   :  { %1248 = vsyncpa [#allocation4 + $0x1], 1 }

// kernel: tpu_custom_call.1
= control target key start
LH: loop header
LB: loop body
LE: loop exit
PB: predicated region body
PF: predicated region fallthrough
CT: control target
= control target key end

     0   :  { %8 = vsyncpa [#allocation4], 0  ;;  %s2393_s0 = inlined_call_operand.vmem [shape: bf16[64,17], index: 0, kind: input, shape index: {}]   ;;  %s2394_s1 = inlined_call_operand.vmem [shape: bf16[17,256], index: 1, kind: input, shape index: {}]   ;;  %s2395_s2 = inlined_call_operand.vmem [shape: bf16[1,64], index: 2, kind: input, shape index: {}]   ;;  %s2396_s3 = inlined_call_operand.hbm [shape: f32[1,256], index: 3, kind: output, shape index: {}]  }
   0x1   :  { %10 = vsyncpa [#allocation4 + $0x1], 0  ;;  %s1590_s12 = smov 0   ;;  %s1592_s13 = smov 0  }
   0x2   :  { %s1594_s14 = smov 0   ;;  %s1596_s15 = smov 0  }
   0x3 LB: > { %s1289_s16 = sadd.s32 4294967295, %s1558_s15   ;;  %s1290_s17 = sadd.s32 4294967294, %s1558_s15   ;;  %s1558_s15 = sphi %s1596_s15, %s2418_s15   ;;  %s1554_s14 = sphi %s1594_s14, %s2417_s14   ;;  %s1550_s13 = sphi %s1592_s13, %s2416_s13   ;;  %s1546_s12 = sphi %s1590_s12, %s2415_s12  }
   0x4   : > { %s1613_s18 = sadd.s32 1, %s1558_s15   ;;  %s44_s19 = sadd.s32 1, %s1554_s14 }
   0x5   : > { %s41_s20 = ssub.s32 %s1558_s15, %s1613_s18  ;;  %p51_p0 = scmp.ne.s32.totalorder %s1554_s14, %s1550_s13 }
   0x6   : > { %p42_p1 = scmp.eq.s32.totalorder %s41_s20, 0  ;;  %p52_p2 = scmp.eq.s32.totalorder %s1558_s15, 0 }
   0x7   : > { %p102_p3 = scmp.eq.s32.totalorder %s1289_s16, 1  ;;  %p107_p4 = scmp.ne.s32.totalorder %s1550_s13, %s1546_s12 }
   0x8   : > { %s1626_s21 = scalar_select %p42_p1, %s1554_s14, %s44_s19  }
   0x9   : > { %p53_p5 = por %p52_p2, %p51_p0  ;;  %p1628_p6 = por %p102_p3, %p51_p0 }
   0xa   : > { %p108_p7 = scmp.eq.s32.totalorder %s1290_s17, 1  ;;  %p1292_p9 = scmp.ge.s32.totalorder %s1558_s15, 2 }
   0xc   : > { %p1632_p8 = por %p108_p7, %p107_p4  ;;  %130 = sbr.rel (%p1292_p9) target bundleno = 26 (0x1a), region = 24 }
  0x13   : > { %133 = sbr.rel (!%p53_p5) target bundleno = 26 (0x1a), region = 28  ;;  %s135_s24 = sand.u32 (%p53_p5), 1, %s1554_s14  }
  0x14   : > { %s1293_s25 = sshll.u32 (%p53_p5), %s1558_s15, 2  ;;  %s1376_s26 = smul.u32 (%p53_p5), 12, %s135_s24 }
  0x15   : > { %s139_s29 = scalar_lea.vmem (%p53_p5), %s2394_s1, %s1293_s25 }
  0x16   : > { %v155_v0 = vld [vmem:[%s139_s29] sm:$0xf] (%p53_p5)  ;;  %v157_v1 = vld [vmem:[%s139_s29 + $0x8] sm:$0xf] (%p53_p5)  ;;  %v159_v2 = vld [vmem:[%s139_s29 + $0x10] sm:$0xf] (%p53_p5) }
  0x17   : > { %s137_s30 = scalar_lea.vmem (%p53_p5), [#allocation2], %s1376_s26 }
  0x18   : > { %156 = vst [vmem:[%s137_s30] sm:$0xf] (%p53_p5), %v155_v0  ;;  %158 = vst [vmem:[%s137_s30 + $0x4] sm:$0xf] (%p53_p5), %v157_v1 }
  0x19   : > { %160 = vst [vmem:[%s137_s30 + $0x8] sm:$0xf] (%p53_p5), %v159_v2 }
  0x1a PF: > { %p1294_p10 = scmp.ge.s32.totalorder %s1558_s15, 1  ;;  %p188_p11 = scmp.lt.s32.totalorder %s1558_s15, 3 }
  0x1c   : > { %p189_p12 = pnand %p1294_p10, %p188_p11 }
  0x1d   : > { %s1647_s4 = sand.u32 (!%p189_p12), 1, %s1550_s13   ;;  %v1460_v3 = vld [vmem:[%s2393_s0] sm:$0xff] (!%p189_p12)   ;;  %vm271_vm0 = vcmask (!%p189_p12), 1040384   ;;  %vm258_vm1 = vcmask (!%p189_p12), 138240   ;;  %v1560_v5 = vmov (!%p189_p12), 0   ;;  %v1461_v9 = vld [vmem:[%s2393_s0 + $0x8] sm:$0xff] (!%p189_p12)  }
  0x1e   : > { %192 = sbr.rel (%p189_p12) target bundleno = 706 (0x2c2), region = 69  ;;  %1356 = vmatprep.mubr.msk.bf16.mxu0 (!%p189_p12), %vm258_vm1, %v1460_v3  ;;  %v273_v6 = vsel (!%p189_p12), %vm271_vm0, 65535, %v1560_v5  ;;  %v1462_v10 = vld [vmem:[%s2393_s0 + $0x10] sm:$0xff] (!%p189_p12)   ;;  %v1463_v11 = vld [vmem:[%s2393_s0 + $0x18] sm:$0xff] (!%p189_p12)   ;;  %v1561_v47 = vmov (!%p189_p12), 683565275  }
  0x1f   : > { %s1377_s7 = smul.u32 (!%p189_p12), 12, %s1647_s4  ;;  %v1562_v51 = vmov (!%p189_p12), 2475754826   ;;  %v1563_v53 = vmov (!%p189_p12), 2131351028   ;;  %s216_s26 = scalar_lea.vmem (!%p189_p12), [#allocation3], %s1647_s4 }
  0x20   : > { %v1564_v55 = vmov (!%p189_p12), 2102212464   ;;  %v1565_v57 = vmov (!%p189_p12), 920167782   ;;  %v1566_v0 = vmov (!%p189_p12), 1326507024  }
  0x21   : > { %s197_s8 = scalar_lea.vmem (!%p189_p12), [#allocation2], %s1377_s7  ;;  %s1229_s27 = sshll.u32 (!%p189_p12), %s216_s26, 4  ;;  %s2346_s27 = int_to_ptr.vmem [resolvable:$true] %s1229_s27 }
  0x22   : > { %v1458_v4 = vld [vmem:[%s197_s8] sm:$0xff] (!%p189_p12)   ;;  %v1459_v7 = vld [vmem:[%s197_s8 + $0x8] ss:$0 sps:$4 sm:$0x11] (!%p189_p12)   ;;  %s1338_s28 = sshll.u32 (!%p189_p12), %s1289_s16, 4  ;;  %s1217_s6 = scalar_lea.sflag (!%p189_p12), [#allocation4], %s1647_s4 }
  0x23   : > { %1352 = vmatprep.subr.bf16.mxu0 (!%p189_p12), %v1458_v4  ;;  %v275_v8 = vand.u32 (!%p189_p12), %v1459_v7, %v273_v6  ;;  %s2351_s5 = scalar_lea.hbm (!%p189_p12), %s2396_s3, %s1338_s28  ;;  %s1496_s7 = scalar_lea.vmem (!%p189_p12), %s2346_s27, 16 }
  0x24   : > { %1353 = vmatpush3.bf16.msra.mxu0 (!%p189_p12), %v1458_v4  ;;  %p1497_p13 = scmp.ne.s32.totalorder (!%p189_p12), %s2346_s27, %s1496_s7  ;;  %s1569_s16 = smov (!%p189_p12), [#allocation3]  }
  0x25   : > { %1354 = vmatprep.subr.bf16.mxu0 %v275_v8  ;;  %s1500_s8 = sshll.u32 %s1569_s16, 4  ;;  %s1501_s8 = int_to_ptr.vmem [resolvable:$false] %s1500_s8 }
  0x26   : > { %p1498_p0 = pnand %p1497_p13, %p1628_p6  ;;  %s1502_s9 = scalar_lea.vmem %s1501_s8, 32 }
  0x27   : > { %p1503_p2 = scmp.lt.s32.totalorder %s2346_s27, %s1501_s8  ;;  %p1504_p3 = scmp.lt.s32.totalorder %s1502_s9, %s1496_s7 }
  0x28   : > { %1355 = vmatpush3.bf16.msra.mxu0 %v275_v8  ;;  %p1499_p1 = pneg %p1498_p0 }
  0x29   : > { %p1505_p4 = por %p1504_p3, %p1503_p2 }
  0x2b   : > { %1357 = vmatmul.mubr.msk.bf16.vlgmr.msra.gmra.mrb[0].mxu0 %vm258_vm1, %v1461_v9  ;;  %p1506_p5 = pnand %p1505_p4, %p1499_p1 }
  0x2c   : > { %1360 = vmatprep.mubr.msk.bf16.mxu0 %vm258_vm1, %v1462_v10 }
  0x33   : > { %1361 = vmatmul.mubr.msk.bf16.gmra.mrb[4].mxu0 %vm258_vm1, %v1463_v11 }
  0xfe   : > { %v1666_v12 = vpop.f32.mrb[0].mxu0 }
  0xff   : > { %v548_v13 = vand.u32 2147483647, %v1666_v12  ;;  %v551_v14 = vand.u32 2139095040, %v1666_v12  ;;  %v1670_v15 = vpop.f32.mrb[1].mxu0 }
 0x100   : > { %v342_v16 = vand.u32 2147483647, %v1670_v15  ;;  %v345_v17 = vand.u32 2139095040, %v1670_v15  ;;  %v1674_v18 = vpop.f32.mrb[2].mxu0 }
 0x101   : > { %v552_v19 = vshrl.u32 %v551_v14, 23  ;;  %v555_v20 = vand.u32 8388607, %v548_v13  ;;  %v654_v23 = vand.u32 2139095040, %v1674_v18  ;;  %v1681_v25 = vpop.f32.mrb[3].mxu0 }
 0x102   : > { %v346_v21 = vshrl.u32 %v345_v17, 23  ;;  %v349_v22 = vand.u32 8388607, %v342_v16  ;;  %v651_v32 = vand.u32 2147483647, %v1674_v18 }
 0x103   : > { %v1313_v24 = vadd.s32 4294967169, %v552_v19  ;;  %v655_v27 = vshrl.u32 %v654_v23, 23  ;;  %v556_v28 = vor.u32 8388608, %v555_v20 }
 0x104   : > { %v1305_v26 = vadd.s32 4294967169, %v346_v21  ;;  %v350_v30 = vor.u32 8388608, %v349_v22  ;;  %v1698_v44 = vand.u32 8388607, %v651_v32 }
 0x105   : > { %v558_v29 = vadd.s32 1, %v1313_v24  ;;  %v1317_v33 = vadd.s32 4294967169, %v655_v27  ;;  %v1692_v42 = vshll.u32 %v556_v28, 8 }
 0x106   : > { %v352_v31 = vadd.s32 1, %v1305_v26  ;;  %v1684_v34 = vpop.f32.mrb[4].mxu0  ;;  %v1694_v43 = vshll.u32 %v350_v30, 8 }
 0x107   : > { %vm559_vm2 = vcmp.gt.s32.totalorder %v558_v29, 0  ;;  %v1686_v35 = vpop.f32.mrb[5].mxu0  ;;  %v1700_v45 = vadd.s32 1, %v1317_v33 }
 0x108   : > { %v560_v36 = vsel %vm559_vm2, %v558_v29, 0  ;;  %vm353_vm3 = vcmp.gt.s32.totalorder %v352_v31, 0  ;;  %v1688_v37 = vpop.f32.mrb[6].mxu0 }
 0x109   : > { %v561_v38 = vshrl.u32 %v560_v36, 5  ;;  %v562_v39 = vand.u32 31, %v560_v36  ;;  %v354_v40 = vsel %vm353_vm3, %v352_v31, 0  ;;  %v1690_v41 = vpop.f32.mrb[7].mxu0  ;;  %vm662_vm8 = vcmp.gt.s32.totalorder %v1700_v45, 0 }
 0x10a   : > { %v1703_v49 = vshrl.u32 %v354_v40, 5  ;;  %v356_v50 = vand.u32 31, %v354_v40 }
 0x10b   : > { %v563_v46 = vsub.s32 32, %v562_v39  ;;  %v565_v48 = vshll.u32 %v1561_v47, %v562_v39  ;;  %v568_v52 = vshll.u32 %v1562_v51, %v562_v39  ;;  %v571_v54 = vshll.u32 %v1563_v53, %v562_v39 }
 0x10c   : > { %v574_v56 = vshll.u32 %v1564_v55, %v562_v39  ;;  %v577_v58 = vshll.u32 %v1565_v57, %v562_v39  ;;  %vm580_vm4 = vcmp.lt.s32.totalorder %v561_v38, 1  ;;  %vm581_vm5 = vcmp.lt.s32.totalorder %v561_v38, 2 }
 0x10d   : > { %v566_v59 = vshrl.u32 %v1562_v51, %v563_v46  ;;  %v569_v60 = vshrl.u32 %v1563_v53, %v563_v46  ;;  %v572_v61 = vshrl.u32 %v1564_v55, %v563_v46  ;;  %v564_v62 = vshrl.u32 %v1561_v47, %v563_v46 }
 0x10e   : > { %v575_v63 = vshrl.u32 %v1565_v57, %v563_v46  ;;  %v578_v1 = vshrl.u32 %v1566_v0, %v563_v46  ;;  %v357_v5 = vsub.s32 32, %v356_v50  ;;  %vm582_vm6 = vcmp.lt.s32.totalorder %v561_v38, 3 }
 0x10f   : > { %v567_v2 = vor.u32 %v566_v59, %v565_v48  ;;  %v570_v3 = vor.u32 %v569_v60, %v568_v52  ;;  %v573_v4 = vor.u32 %v572_v61, %v571_v54  ;;  %vm583_vm7 = vcmp.lt.s32.totalorder %v561_v38, 4 }
 0x110   : > { %v576_v6 = vor.u32 %v575_v63, %v574_v56  ;;  %v579_v7 = vor.u32 %v578_v1, %v577_v58  ;;  %v359_v20 = vshll.u32 %v1561_v47, %v356_v50  ;;  %v360_v23 = vshrl.u32 %v1562_v51, %v357_v5 }
 0x111   : > { %v584_v8 = vsel %vm580_vm4, %v564_v62, %v567_v2  ;;  %v585_v9 = vsel %vm583_vm7, %v573_v4, 2102212464  ;;  %v588_v10 = vsel %vm580_vm4, %v567_v2, %v570_v3  ;;  %v592_v11 = vsel %vm580_vm4, %v570_v3, %v573_v4 }
 0x112   : > { %v586_v14 = vsel %vm582_vm6, %v570_v3, %v585_v9  ;;  %v589_v17 = vsel %vm583_vm7, %v576_v6, 920167782  ;;  %v593_v19 = vsel %vm583_vm7, %v579_v7, 1326507024  ;;  %v362_v24 = vshll.u32 %v1562_v51, %v356_v50 }
 0x113   : > { %v590_v21 = vsel %vm582_vm6, %v573_v4, %v589_v17  ;;  %v594_v22 = vsel %vm582_vm6, %v576_v6, %v593_v19  ;;  %v587_v26 = vsel %vm581_vm5, %v584_v8, %v586_v14  ;;  %v363_v29 = vshrl.u32 %v1563_v53, %v357_v5 }
 0x114   : > { %v591_v27 = vsel %vm581_vm5, %v588_v10, %v590_v21  ;;  %v595_v28 = vsel %vm581_vm5, %v592_v11, %v594_v22  ;;  %v361_v39 = vor.u32 %v360_v23, %v359_v20  ;;  %v365_v46 = vshll.u32 %v1563_v53, %v356_v50 }
 0x115   : > { %v1727_v30 = vmul.u32.u64.low %v1692_v42, %v595_v28  ;;  %v1728_v31 = vmul.u32.u64.high %v1692_v42, %v595_v28, %v1727_v30  ;;  %v1731_v33 = vmul.u32.u64.low %v1692_v42, %v591_v27  ;;  %v1732_v36 = vmul.u32.u64.high %v1692_v42, %v591_v27, %v1731_v33 }
 0x116   : > { %v364_v40 = vor.u32 %v363_v29, %v362_v24  ;;  %v366_v48 = vshrl.u32 %v1564_v55, %v357_v5  ;;  %v358_v38 = vshrl.u32 %v1561_v47, %v357_v5  ;;  %v368_v52 = vshll.u32 %v1564_v55, %v356_v50 }
 0x117   : > { %v369_v54 = vshrl.u32 %v1565_v57, %v357_v5  ;;  %v372_v56 = vshrl.u32 %v1566_v0, %v357_v5  ;;  %v603_v58 = vmul.u32 %v1692_v42, %v587_v26  ;;  %v371_v60 = vshll.u32 %v1565_v57, %v356_v50 }
 0x118   : > { %v367_v59 = vor.u32 %v366_v48, %v365_v46  ;;  %vm374_vm9 = vcmp.lt.s32.totalorder %v1703_v49, 1  ;;  %vm605_vm10 = vc.u32 %v1728_v31, %v1731_v33  ;;  %v606_v61 = vadd.s32 1, %v1732_v36 }
 0x119   : > { %v370_v62 = vor.u32 %v369_v54, %v368_v52  ;;  %vm375_vm11 = vcmp.lt.s32.totalorder %v1703_v49, 2  ;;  %v373_v63 = vor.u32 %v372_v56, %v371_v60  ;;  %vm376_vm12 = vcmp.lt.s32.totalorder %v1703_v49, 3 }
 0x11a   : > { %vm377_vm13 = vcmp.lt.s32.totalorder %v1703_v49, 4  ;;  %v382_v1 = vsel %vm374_vm9, %v361_v39, %v364_v40  ;;  %v607_v42 = vsel %vm605_vm10, %v606_v61, %v1732_v36  ;;  %v386_v3 = vsel %vm374_vm9, %v364_v40, %v367_v59 }
 0x11b   : > { %v379_v2 = vsel %vm377_vm13, %v367_v59, 2102212464  ;;  %v383_v50 = vsel %vm377_vm13, %v370_v62, 920167782  ;;  %v608_v4 = vadd.s32 %v607_v42, %v603_v58  ;;  %v378_v5 = vsel %vm374_vm9, %v358_v38, %v361_v39 }
 0x11c   : > { %v384_v6 = vsel %vm376_vm12, %v367_v59, %v383_v50  ;;  %v387_v7 = vsel %vm377_vm13, %v373_v63, 1326507024  ;;  %v380_v8 = vsel %vm376_vm12, %v364_v40, %v379_v2  ;;  %v663_v11 = vsel %vm662_vm8, %v1700_v45, 0 }
 0x11d   : > { %v385_v9 = vsel %vm375_vm11, %v382_v1, %v384_v6  ;;  %v388_v10 = vsel %vm376_vm12, %v370_v62, %v387_v7  ;;  %v609_v14 = vadd.s32 536870912, %v608_v4  ;;  %v448_v23 = vand.u32 2139095040, %v1681_v25 }
 0x11e   : > { %v389_v17 = vsel %vm375_vm11, %v386_v3, %v388_v10  ;;  %v1759_v19 = vmul.u32.u64.low %v1694_v43, %v385_v9  ;;  %v1760_v20 = vmul.u32.u64.high %v1694_v43, %v385_v9, %v1759_v19  ;;  %v381_v45 = vsel %vm375_vm11, %v378_v5, %v380_v8 }
 0x11f   : > { %v1764_v21 = vmul.u32.u64.low %v1694_v43, %v389_v17  ;;  %v1765_v22 = vmul.u32.u64.high %v1694_v43, %v389_v17, %v1764_v21  ;;  %v1768_v24 = vshrl.u32 %v609_v14, 30  ;;  %v665_v26 = vand.u32 31, %v663_v11 }
 0x120   : > { %v400_v28 = vadd.s32 1, %v1760_v20  ;;  %v659_v29 = vor.u32 8388608, %v1698_v44  ;;  %v397_v36 = vmul.u32 %v1694_v43, %v381_v45  ;;  %v449_v39 = vshrl.u32 %v448_v23, 23 }
 0x121   : > { %v611_v27 = vshll.u32 %v1768_v24, 30  ;;  %v666_v30 = vsub.s32 32, %v665_v26  ;;  %vm399_vm14 = vc.u32 %v1765_v22, %v1759_v19  ;;  %v664_v49 = vshrl.u32 %v663_v11, 5 }
 0x122   : > { %v401_v46 = vsel %vm399_vm14, %v400_v28, %v1760_v20  ;;  %v668_v48 = vshll.u32 %v1561_v47, %v665_v26  ;;  %v671_v54 = vshll.u32 %v1562_v51, %v665_v26  ;;  %v674_v56 = vshll.u32 %v1563_v53, %v665_v26 }
 0x123   : > { %v1778_v40 = vsub.s32 %v608_v4, %v611_v27  ;;  %v402_v38 = vadd.s32 %v401_v46, %v397_v36  ;;  %v669_v52 = vshrl.u32 %v1562_v51, %v666_v30  ;;  %v672_v44 = vshrl.u32 %v1563_v53, %v666_v30 }
 0x124   : > { %v675_v58 = vshrl.u32 %v1564_v55, %v666_v30  ;;  %v1788_v59 = vshll.u32 %v659_v29, 8  ;;  %v1309_v63 = vadd.s32 4294967169, %v449_v39  ;;  %v677_v2 = vshll.u32 %v1564_v55, %v665_v26 }
 0x125   : > { %v614_v43 = vsub.s32 0, %v1778_v40  ;;  %v403_v60 = vadd.s32 536870912, %v402_v38  ;;  %v670_v61 = vor.u32 %v669_v52, %v668_v48  ;;  %v673_v62 = vor.u32 %v672_v44, %v671_v54 }
 0x126   : > { %v676_v42 = vor.u32 %v675_v58, %v674_v56  ;;  %v678_v50 = vshrl.u32 %v1565_v57, %v666_v30  ;;  %v680_v4 = vshll.u32 %v1565_v57, %v665_v26  ;;  %v681_v5 = vshrl.u32 %v1566_v0, %v666_v30 }
 0x127   : > { %v1314_v1 = vmin.u32 %v614_v43, %v1778_v40  ;;  %v1793_v3 = vshrl.u32 %v403_v60, 30  ;;  %vm683_vm15 = vcmp.lt.s32.totalorder %v664_v49, 1  ;;  %vm684_vm0 = vcmp.lt.s32.totalorder %v664_v49, 2 }
 0x128   : > { %v679_v7 = vor.u32 %v678_v50, %v677_v2  ;;  %vm685_vm1 = vcmp.lt.s32.totalorder %v664_v49, 3  ;;  %v682_v9 = vor.u32 %v681_v5, %v680_v4  ;;  %vm686_vm2 = vcmp.lt.s32.totalorder %v664_v49, 4 }
 0x129   : > { %v616_v6 = vclz %v1314_v1  ;;  %v405_v8 = vshll.u32 %v1793_v3, 30  ;;  %v691_v10 = vsel %vm683_vm15, %v670_v61, %v673_v62  ;;  %v695_v17 = vsel %vm683_vm15, %v673_v62, %v676_v42 }
 0x12a   : > { %v692_v14 = vsel %vm686_vm2, %v679_v7, 920167782  ;;  %v455_v20 = vadd.s32 1, %v1309_v63  ;;  %v667_v23 = vshrl.u32 %v1561_v47, %v666_v30  ;;  %v696_v26 = vsel %vm686_vm2, %v682_v9, 1326507024 }
 0x12b   : > { %v1315_v11 = vadd.s32 4294967294, %v616_v6  ;;  %v1800_v21 = vsub.s32 %v402_v38, %v405_v8  ;;  %v693_v45 = vsel %vm685_vm1, %v676_v42, %v692_v14  ;;  %v688_v27 = vsel %vm686_vm2, %v676_v42, 2102212464 }
 0x12c   : > { %v694_v28 = vsel %vm684_vm0, %v691_v10, %v693_v45  ;;  %v697_v29 = vsel %vm685_vm1, %v679_v7, %v696_v26  ;;  %vm456_vm4 = vcmp.gt.s32.totalorder %v455_v20, 0  ;;  %v687_v48 = vsel %vm683_vm15, %v667_v23, %v670_v61 }
 0x12d   : > { %vm1316_vm3 = vcmp.lt.s32.totalorder %v1315_v11, 0  ;;  %v408_v39 = vsub.s32 0, %v1800_v21  ;;  %v698_v46 = vsel %vm684_vm0, %v695_v17, %v697_v29  ;;  %v445_v38 = vand.u32 2147483647, %v1681_v25 }
 0x12e   : > { %v619_v36 = vsel %vm1316_vm3, 0, %v1315_v11  ;;  %v457_v30 = vsel %vm456_vm4, %v455_v20, 0  ;;  %v689_v54 = vsel %vm685_vm1, %v673_v62, %v688_v27  ;;  %v604_v6 = vadd.s32 %v1731_v33, %v1728_v31 }
 0x12f   : > { %v1306_v52 = vmin.u32 %v408_v39, %v1800_v21  ;;  %v1813_v44 = vmul.u32.u64.low %v1788_v59, %v698_v46  ;;  %v1814_v43 = vmul.u32.u64.high %v1788_v59, %v698_v46, %v1813_v44  ;;  %v624_v56 = vsub.s32 4294967266, %v619_v36 }
 0x130   : > { %v1817_v58 = vmul.u32.u64.low %v1788_v59, %v694_v28  ;;  %v1818_v60 = vmul.u32.u64.high %v1788_v59, %v694_v28, %v1817_v58  ;;  %v459_v1 = vand.u32 31, %v457_v30  ;;  %v690_v61 = vsel %vm684_vm0, %v687_v48, %v689_v54 }
 0x131   : > { %v410_v63 = vclz %v1306_v52  ;;  %v452_v62 = vand.u32 8388607, %v445_v38  ;;  %v625_v50 = vadd.s32 127, %v624_v56  ;;  %v706_v5 = vmul.u32 %v1788_v59, %v690_v61 }
 0x132   : > { %vm708_vm5 = vc.u32 %v1814_v43, %v1817_v58  ;;  %v460_v2 = vsub.s32 32, %v459_v1  ;;  %v709_v4 = vadd.s32 1, %v1818_v60  ;;  %v620_v7 = vsub.s32 32, %v619_v36 }
 0x133   : > { %v1307_v42 = vadd.s32 4294967294, %v410_v63  ;;  %v453_v10 = vor.u32 8388608, %v452_v62  ;;  %v626_v17 = vshll.u32 %v625_v50, 23  ;;  %v634_v20 = vsub.s32 4, %v1768_v24 }
 0x134   : > { %v710_v8 = vsel %vm708_vm5, %v709_v4, %v1818_v60  ;;  %v463_v11 = vshrl.u32 %v1562_v51, %v460_v2  ;;  %v466_v14 = vshrl.u32 %v1563_v53, %v460_v2  ;;  %v398_v59 = vadd.s32 %v1759_v19, %v1765_v22 }
 0x135   : > { %vm1308_vm6 = vcmp.lt.s32.totalorder %v1307_v42, 0  ;;  %v711_v9 = vadd.s32 %v710_v8, %v706_v5  ;;  %v462_v33 = vshll.u32 %v1561_v47, %v459_v1  ;;  %v465_v45 = vshll.u32 %v1562_v51, %v459_v1 }
 0x136   : > { %v1830_v49 = vsel %vm1308_vm6, 0, %v1307_v42  ;;  %v469_v26 = vshrl.u32 %v1564_v55, %v460_v2  ;;  %v622_v27 = vshrl.u32 %v604_v6, %v620_v7  ;;  %v458_v28 = vshrl.u32 %v457_v30, 5 }
 0x137   : > { %v418_v23 = vsub.s32 4294967266, %v1830_v49  ;;  %v712_v31 = vadd.s32 536870912, %v711_v9  ;;  %v471_v29 = vshll.u32 %v1564_v55, %v459_v1  ;;  %v472_v39 = vshrl.u32 %v1565_v57, %v460_v2 }
 0x138   : > { %v464_v48 = vor.u32 %v463_v11, %v462_v33  ;;  %v467_v52 = vor.u32 %v466_v14, %v465_v45  ;;  %v468_v19 = vshll.u32 %v1563_v53, %v459_v1  ;;  %v474_v44 = vshll.u32 %v1565_v57, %v459_v1 }
 0x139   : > { %v1844_v46 = vshrl.u32 %v712_v31, 30  ;;  %v419_v22 = vadd.s32 127, %v418_v23  ;;  %v473_v54 = vor.u32 %v472_v39, %v471_v29  ;;  %v475_v56 = vshrl.u32 %v1566_v0, %v460_v2 }
 0x13a   : > { %v621_v60 = vshll.u32 %v1778_v40, %v619_v36  ;;  %v627_v63 = vor.u32 4788187, %v626_v17  ;;  %v470_v61 = vor.u32 %v469_v26, %v468_v19  ;;  %v414_v42 = vsub.s32 32, %v1830_v49 }
 0x13b   : > { %v714_v30 = vshll.u32 %v1844_v46, 30  ;;  %v476_v62 = vor.u32 %v475_v56, %v474_v44  ;;  %vm477_vm7 = vcmp.lt.s32.totalorder %v458_v28, 1  ;;  %vm478_vm8 = vcmp.lt.s32.totalorder %v458_v28, 2 }
 0x13c   : > { %v623_v50 = vor.u32 %v622_v27, %v621_v60  ;;  %vm479_vm9 = vcmp.lt.s32.totalorder %v458_v28, 3  ;;  %vm480_vm10 = vcmp.lt.s32.totalorder %v458_v28, 4  ;;  %v420_v5 = vshll.u32 %v419_v22, 23 }
 0x13d   : > { %v1852_v4 = vsub.s32 %v711_v9, %v714_v30  ;;  %v461_v1 = vshrl.u32 %v1561_v47, %v460_v2  ;;  %v485_v6 = vsel %vm477_vm7, %v464_v48, %v467_v52  ;;  %v486_v40 = vsel %vm480_vm10, %v473_v54, 920167782 }
 0x13e   : > { %v628_v36 = vand.u32 2147483647, %v627_v63  ;;  %v415_v7 = vshll.u32 %v1800_v21, %v1830_v49  ;;  %v487_v11 = vsel %vm479_vm9, %v470_v61, %v486_v40  ;;  %v416_v14 = vshrl.u32 %v398_v59, %v414_v42 }
 0x13f   : > { %v717_v8 = vsub.s32 0, %v1852_v4  ;;  %v482_v17 = vsel %vm480_vm10, %v470_v61, 2102212464  ;;  %v489_v9 = vsel %vm477_vm7, %v467_v52, %v470_v61  ;;  %v490_v23 = vsel %vm480_vm10, %v476_v62, 1326507024 }
 0x140   : > { %v488_v2 = vsel %vm478_vm8, %v485_v6, %v487_v11  ;;  %v491_v33 = vsel %vm479_vm9, %v473_v54, %v490_v23  ;;  %v493_v45 = vshll.u32 %v453_v10, 8  ;;  %v421_v26 = vor.u32 4788187, %v420_v5 }
 0x141   : > { %v1318_v31 = vmin.u32 %v717_v8, %v1852_v4  ;;  %v481_v27 = vsel %vm477_vm7, %v461_v1, %v464_v48  ;;  %v492_v21 = vsel %vm478_vm8, %v489_v9, %v491_v33  ;;  %v963_v49 = vand.u32 2139095040, %v1684_v34 }
 0x142   : > { %v483_v59 = vsel %vm479_vm9, %v467_v52, %v482_v17  ;;  %v1868_v39 = vmul.u32.u64.low %v493_v45, %v492_v21  ;;  %v1869_v19 = vmul.u32.u64.high %v493_v45, %v492_v21, %v1868_v39  ;;  %v630_v22 = vcvt.s32.f32 %v623_v50 }
 0x143   : > { %v719_v29 = vclz %v1318_v31  ;;  %v1871_v44 = vmul.u32.u64.low %v493_v45, %v488_v2  ;;  %v1872_v56 = vmul.u32.u64.high %v493_v45, %v488_v2, %v1871_v44  ;;  %vm550_vm11 = vcmp.lt.s32.totalorder %v1666_v12, 0 }
 0x144   : > { %v417_v10 = vor.u32 %v416_v14, %v415_v7  ;;  %v964_v48 = vshrl.u32 %v963_v49, 23  ;;  %v631_v60 = vmul.f32 %v630_v22, %v628_v36  ;;  %v635_v52 = vsel %vm550_vm11, %v634_v20, %v1768_v24 }
 0x145   : > { %v1319_v54 = vadd.s32 4294967294, %v719_v29  ;;  %v422_v63 = vand.u32 2147483647, %v421_v26  ;;  %v484_v30 = vsel %vm478_vm8, %v481_v27, %v483_v59  ;;  %vm502_vm13 = vc.u32 %v1869_v19, %v1871_v44 }
 0x146   : > { %v960_v61 = vand.u32 2147483647, %v1684_v34  ;;  %v1329_v42 = vadd.s32 4294967169, %v964_v48  ;;  %vm1887_vm14 = vcmp.le.f32.partialorder %v548_v13, 0.7853982  ;;  %v503_v50 = vadd.s32 1, %v1872_v56 }
 0x147   : > { %vm1320_vm12 = vcmp.lt.s32.totalorder %v1319_v54, 0  ;;  %v424_v5 = vcvt.s32.f32 %v417_v10  ;;  %v500_v20 = vmul.u32 %v493_v45, %v484_v30  ;;  %v632_v1 = vxor.u32 2147483648, %v631_v60 }
 0x148   : > { %v1892_v24 = vsel %vm1320_vm12, 0, %v1319_v54  ;;  %v970_v28 = vadd.s32 1, %v1329_v42  ;;  %v637_v6 = vsel %vm1887_vm14, 0, %v635_v52  ;;  %v504_v40 = vsel %vm502_vm13, %v503_v50, %v1872_v56 }
 0x149   : > { %v1897_v36 = vmul.f32 %v424_v5, %v422_v63  ;;  %v505_v7 = vadd.s32 %v504_v40, %v500_v20  ;;  %v967_v13 = vand.u32 8388607, %v960_v61  ;;  %v727_v8 = vsub.s32 4294967266, %v1892_v24 }
 0x14a   : > { %vm971_vm15 = vcmp.gt.s32.totalorder %v970_v28, 0  ;;  %v1902_v14 = vand.u32 3, %v637_v6  ;;  %v1906_v9 = vsel %vm550_vm11, %v632_v1, %v631_v60  ;;  %v707_v23 = vadd.s32 %v1817_v58, %v1814_v43 }
 0x14b   : > { %v972_v11 = vsel %vm971_vm15, %v970_v28, 0  ;;  %v506_v17 = vadd.s32 536870912, %v505_v7  ;;  %v737_v31 = vsub.s32 4, %v1844_v46  ;;  %v426_v33 = vxor.u32 2147483648, %v1897_v36 }
 0x14c   : > { %v974_v2 = vand.u32 31, %v972_v11  ;;  %v968_v26 = vor.u32 8388608, %v967_v13  ;;  %v754_v27 = vand.u32 2147483647, %v1686_v35  ;;  %v723_v21 = vsub.s32 32, %v1892_v24 }
 0x14d   : > { %v1912_v45 = vshrl.u32 %v506_v17, 30  ;;  %v728_v49 = vadd.s32 127, %v727_v8  ;;  %v757_v59 = vand.u32 2139095040, %v1686_v35  ;;  %v973_v22 = vshrl.u32 %v972_v11, 5 }
 0x14e   : > { %v975_v29 = vsub.s32 32, %v974_v2  ;;  %v977_v43 = vshll.u32 %v1561_v47, %v974_v2  ;;  %v980_v58 = vshll.u32 %v1562_v51, %v974_v2  ;;  %v983_v54 = vshll.u32 %v1563_v53, %v974_v2 }
 0x14f   : > { %v508_v39 = vshll.u32 %v1912_v45, 30  ;;  %v986_v52 = vshll.u32 %v1564_v55, %v974_v2  ;;  %v1928_v30 = vshll.u32 %v968_v26, 8  ;;  %v758_v20 = vshrl.u32 %v757_v59, 23 }
 0x150   : > { %v978_v56 = vshrl.u32 %v1562_v51, %v975_v29  ;;  %v981_v10 = vshrl.u32 %v1563_v53, %v975_v29  ;;  %v984_v48 = vshrl.u32 %v1564_v55, %v975_v29  ;;  %v987_v63 = vshrl.u32 %v1565_v57, %v975_v29 }
 0x151   : > { %v1924_v60 = vsub.s32 %v505_v7, %v508_v39  ;;  %v989_v6 = vshll.u32 %v1565_v57, %v974_v2  ;;  %v990_v40 = vshrl.u32 %v1566_v0, %v975_v29  ;;  %vm344_vm0 = vcmp.lt.s32.totalorder %v1670_v15, 0 }
 0x152   : > { %v979_v42 = vor.u32 %v978_v56, %v977_v43  ;;  %v982_v50 = vor.u32 %v981_v10, %v980_v58  ;;  %v985_v5 = vor.u32 %v984_v48, %v983_v54  ;;  %v988_v1 = vor.u32 %v987_v63, %v986_v52 }
 0x153   : > { %v511_v28 = vsub.s32 0, %v1924_v60  ;;  %vm653_vm1 = vcmp.lt.s32.totalorder %v1674_v18, 0  ;;  %v725_v7 = vshrl.u32 %v707_v23, %v723_v21  ;;  %v729_v13 = vshll.u32 %v728_v49, 23 }
 0x154   : > { %vm992_vm2 = vcmp.lt.s32.totalorder %v973_v22, 1  ;;  %vm995_vm3 = vcmp.lt.s32.totalorder %v973_v22, 4  ;;  %v976_v11 = vshrl.u32 %v1561_v47, %v975_v29  ;;  %v991_v17 = vor.u32 %v990_v40, %v989_v6 }
 0x155   : > { %v1310_v8 = vmin.u32 %v511_v28, %v1924_v60  ;;  %v997_v26 = vsel %vm995_vm3, %v985_v5, 2102212464  ;;  %vm994_vm4 = vcmp.lt.s32.totalorder %v973_v22, 3  ;;  %v1000_v2 = vsel %vm992_vm2, %v979_v42, %v982_v50 }
 0x156   : > { %v1001_v59 = vsel %vm995_vm3, %v988_v1, 920167782  ;;  %v1321_v39 = vadd.s32 4294967169, %v758_v20  ;;  %vm993_vm5 = vcmp.lt.s32.totalorder %v973_v22, 2  ;;  %v996_v23 = vsel %vm992_vm2, %v976_v11, %v979_v42 }
 0x157   : > { %v513_v43 = vclz %v1310_v8  ;;  %v1002_v21 = vsel %vm994_vm4, %v985_v5, %v1001_v59  ;;  %vm1943_vm6 = vcmp.le.f32.partialorder %v342_v16, 0.7853982  ;;  %vm1949_vm7 = vcmp.le.f32.partialorder %v651_v32, 0.7853982 }
 0x158   : > { %v998_v58 = vsel %vm994_vm4, %v982_v50, %v997_v26  ;;  %v1003_v56 = vsel %vm993_vm5, %v1000_v2, %v1002_v21  ;;  %v1004_v10 = vsel %vm992_vm2, %v982_v50, %v985_v5  ;;  %v1005_v54 = vsel %vm995_vm3, %v991_v17, 1326507024 }
 0x159   : > { %v1311_v48 = vadd.s32 4294967294, %v513_v43  ;;  %v1006_v52 = vsel %vm994_vm4, %v988_v1, %v1005_v54  ;;  %v1957_v16 = vmul.u32.u64.low %v1928_v30, %v1003_v56  ;;  %v1958_v63 = vmul.u32.u64.high %v1928_v30, %v1003_v56, %v1957_v16 }
 0x15a   : > { %v724_v32 = vshll.u32 %v1852_v4, %v1892_v24  ;;  %v730_v42 = vor.u32 4788187, %v729_v13  ;;  %v1007_v20 = vsel %vm993_vm5, %v1004_v10, %v1006_v52  ;;  %v764_v28 = vadd.s32 1, %v1321_v39 }
 0x15b   : > { %v428_v6 = vsub.s32 4, %v1793_v3  ;;  %vm1312_vm8 = vcmp.lt.s32.totalorder %v1311_v48, 0  ;;  %v1966_v50 = vmul.u32.u64.low %v1928_v30, %v1007_v20  ;;  %v1967_v5 = vmul.u32.u64.high %v1928_v30, %v1007_v20, %v1966_v50 }
 0x15c   : > { %v726_v1 = vor.u32 %v725_v7, %v724_v32  ;;  %v1969_v40 = vsel %vm1312_vm8, 0, %v1311_v48  ;;  %v999_v8 = vsel %vm993_vm5, %v996_v23, %v998_v58  ;;  %vm765_vm9 = vcmp.gt.s32.totalorder %v764_v28, 0 }
 0x15d   : > { %v636_v4 = vsel %vm1887_vm14, %v1666_v12, %v1906_v9  ;;  %v427_v24 = vsel %vm344_vm0, %v426_v33, %v1897_v36  ;;  %v1986_v7 = vsel %vm653_vm1, %v737_v31, %v1844_v46  ;;  %v1018_v22 = vadd.s32 1, %v1958_v63 }
 0x15e   : > { %v731_v13 = vand.u32 2147483647, %v730_v42  ;;  %v521_v11 = vsub.s32 4294967266, %v1969_v40  ;;  %v761_v62 = vand.u32 8388607, %v754_v27  ;;  %v766_v9 = vsel %vm765_vm9, %v764_v28, 0 }
 0x15f   : > { %v1995_v36 = vsel %vm344_vm0, %v428_v6, %v1793_v3  ;;  %v1015_v33 = vmul.u32 %v1928_v30, %v999_v8  ;;  %vm1017_vm10 = vc.u32 %v1967_v5, %v1957_v16  ;;  %v1066_v46 = vand.u32 2139095040, %v1688_v37 }
 0x160   : > { %1464 = vcosq.f32 %v636_v4  ;;  %v733_v31 = vcvt.s32.f32 %v726_v1  ;;  %v1019_v17 = vsel %vm1017_vm10, %v1018_v22, %v1958_v63  ;;  %v768_v26 = vand.u32 31, %v766_v9 }
 0x161   : > { %1466 = vsinq.f32 %v636_v4  ;;  %v2005_v2 = vsel %vm1943_vm6, %v1670_v15, %v427_v24  ;;  %v740_v3 = vsel %vm1949_vm7, 0, %v1986_v7  ;;  %v1020_v30 = vadd.s32 %v1019_v17, %v1015_v33 }
 0x162   : > { %v2010_v59 = vmul.f32 %v733_v31, %v731_v13  ;;  %v522_v39 = vadd.s32 127, %v521_v11  ;;  %v762_v43 = vor.u32 8388608, %v761_v62  ;;  %v769_v23 = vsub.s32 32, %v768_v26 }
 0x163   : > { %v517_v21 = vsub.s32 32, %v1969_v40  ;;  %v1021_v58 = vadd.s32 536870912, %v1020_v30  ;;  %v767_v56 = vshrl.u32 %v766_v9, 5  ;;  %v1067_v10 = vshrl.u32 %v1066_v46, 23 }
 0x164   : > { %v771_v54 = vshll.u32 %v1561_v47, %v768_v26  ;;  %v772_v48 = vshrl.u32 %v1562_v51, %v769_v23  ;;  %v775_v52 = vshrl.u32 %v1563_v53, %v769_v23  ;;  %v778_v63 = vshrl.u32 %v1564_v55, %v769_v23 }
 0x165   : > { %v2017_v32 = vshrl.u32 %v1021_v58, 30  ;;  %v774_v42 = vshll.u32 %v1562_v51, %v768_v26  ;;  %v777_v20 = vshll.u32 %v1563_v53, %v768_v26  ;;  %v781_v28 = vshrl.u32 %v1565_v57, %v769_v23 }
 0x166   : > { %v523_v6 = vshll.u32 %v522_v39, 23  ;;  %v780_v50 = vshll.u32 %v1564_v55, %v768_v26  ;;  %v783_v1 = vshll.u32 %v1565_v57, %v768_v26  ;;  %v784_v8 = vshrl.u32 %v1566_v0, %v769_v23 }
 0x167   : > { %v1023_v4 = vshll.u32 %v2017_v32, 30  ;;  %v773_v24 = vor.u32 %v772_v48, %v771_v54  ;;  %v776_v7 = vor.u32 %v775_v52, %v774_v42  ;;  %v779_v22 = vor.u32 %v778_v63, %v777_v20 }
 0x168   : > { %v501_v13 = vadd.s32 %v1871_v44, %v1869_v19  ;;  %v782_v11 = vor.u32 %v781_v28, %v780_v50  ;;  %v802_v62 = vshll.u32 %v762_v43, 8  ;;  %v1063_v9 = vand.u32 2147483647, %v1688_v37 }
 0x169   : > { %v735_v33 = vxor.u32 2147483648, %v2010_v59  ;;  %v518_v46 = vshll.u32 %v1924_v60, %v1969_v40  ;;  %v2032_v31 = vsub.s32 %v1020_v30, %v1023_v4  ;;  %v785_v17 = vor.u32 %v784_v8, %v783_v1 }
 0x16a   : > { %v2034_v26 = vpop.eup %1464  ;;  %v519_v39 = vshrl.u32 %v501_v13, %v517_v21  ;;  %vm786_vm11 = vcmp.lt.s32.totalorder %v767_v56, 1  ;;  %vm789_vm12 = vcmp.lt.s32.totalorder %v767_v56, 4  ;;  %v1333_v58 = vadd.s32 4294967169, %v1067_v10 }
 0x16b   : > { %v2036_v54 = vpop.eup %1466  ;;  %v524_v19 = vor.u32 4788187, %v523_v6  ;;  %v1026_v44 = vsub.s32 0, %v2032_v31  ;;  %v791_v43 = vsel %vm789_vm12, %v779_v22, 2102212464  ;;  %v794_v48 = vsel %vm786_vm11, %v773_v24, %v776_v7 }
 0x16c   : > { %v770_v52 = vshrl.u32 %v1561_v47, %v769_v23  ;;  %vm788_vm13 = vcmp.lt.s32.totalorder %v767_v56, 3  ;;  %v795_v60 = vsel %vm789_vm12, %v782_v11, 920167782  ;;  %v798_v40 = vsel %vm786_vm11, %v776_v7, %v779_v22 }
 0x16d   : > { %v1330_v30 = vmin.u32 %v1026_v44, %v2032_v31  ;;  %vm787_vm14 = vcmp.lt.s32.totalorder %v767_v56, 2  ;;  %v796_v21 = vsel %vm788_vm13, %v779_v22, %v795_v60  ;;  %v799_v63 = vsel %vm789_vm12, %v785_v17, 1326507024 }
 0x16e   : > { %v790_v10 = vsel %vm786_vm11, %v770_v52, %v773_v24  ;;  %v792_v42 = vsel %vm788_vm13, %v776_v7, %v791_v43  ;;  %v797_v20 = vsel %vm787_vm14, %v794_v48, %v796_v21  ;;  %v800_v28 = vsel %vm788_vm13, %v782_v11, %v799_v63 }
 0x16f   : > { %v1028_v6 = vclz %v1330_v30  ;;  %v801_v50 = vsel %vm787_vm14, %v798_v40, %v800_v28  ;;  %v2046_v1 = vmul.u32.u64.low %v802_v62, %v797_v20  ;;  %v2047_v23 = vmul.u32.u64.high %v802_v62, %v797_v20, %v2046_v1 }
 0x170   : > { %v2050_v8 = vand.u32 3, %v740_v3  ;;  %v2052_v4 = vmul.u32.u64.low %v802_v62, %v801_v50  ;;  %v2053_v13 = vmul.u32.u64.high %v802_v62, %v801_v50, %v2052_v4  ;;  %v1073_v22 = vadd.s32 1, %v1333_v58 }
 0x171   : > { %1468 = vsinq.f32 %v2005_v2  ;;  %v520_v24 = vor.u32 %v519_v39, %v518_v46  ;;  %v1331_v7 = vadd.s32 4294967294, %v1028_v6  ;;  %v793_v17 = vsel %vm787_vm14, %v790_v10, %v792_v42 }
 0x172   : > { %v736_v11 = vsel %vm653_vm1, %v735_v33, %v2010_v59  ;;  %v1070_v44 = vand.u32 8388607, %v1063_v9  ;;  %vm1074_vm15 = vcmp.gt.s32.totalorder %v1073_v22, 0  ;;  %v525_v3 = vand.u32 2147483647, %v524_v19 }
 0x173   : > { %vm1332_vm0 = vcmp.lt.s32.totalorder %v1331_v7, 0  ;;  %v812_v43 = vadd.s32 1, %v2047_v23  ;;  %v1075_v48 = vsel %vm1074_vm15, %v1073_v22, 0  ;;  %v1567_v58 = vmov 0.0  }
 0x174   : > { %1364 = vmatprep.subr.bf16.mxu1 %v1567_v58  ;;  %v531_v46 = vsub.s32 4, %v1912_v45  ;;  %v1031_v56 = vsel %vm1332_vm0, 0, %v1331_v7  ;;  %v809_v39 = vmul.u32 %v802_v62, %v793_v17  ;;  %vm811_vm2 = vc.u32 %v2053_v13, %v2046_v1 }
 0x175   : > { %v527_v59 = vcvt.s32.f32 %v520_v24  ;;  %v1032_v33 = vsub.s32 32, %v1031_v56  ;;  %v1036_v52 = vsub.s32 4294967266, %v1031_v56  ;;  %v813_v60 = vsel %vm811_vm2, %v812_v43, %v2047_v23 }
 0x176   : > { %v2071_v19 = vsel %vm1949_vm7, %v1674_v18, %v736_v11  ;;  %v814_v40 = vadd.s32 %v813_v60, %v809_v39  ;;  %v1071_v30 = vor.u32 8388608, %v1070_v44  ;;  %v1077_v21 = vand.u32 31, %v1075_v48 }
 0x177   : > { %v528_v63 = vmul.f32 %v527_v59, %v525_v3  ;;  %v1016_v62 = vadd.s32 %v1957_v16, %v1967_v5  ;;  %v1037_v10 = vadd.s32 127, %v1036_v52  ;;  %v860_v42 = vand.u32 2139095040, %v1690_v41 }
 0x178   : > { %v1033_v20 = vshll.u32 %v2032_v31, %v1031_v56  ;;  %v815_v28 = vadd.s32 536870912, %v814_v40  ;;  %v2077_v6 = vshrl.u32 %v1075_v48, 5  ;;  %v1078_v50 = vsub.s32 32, %v1077_v21 }
 0x179   : > { %v1034_v23 = vshrl.u32 %v1016_v62, %v1032_v33  ;;  %v1038_v29 = vshll.u32 %v1037_v10, 23  ;;  %v1080_v4 = vshll.u32 %v1561_v47, %v1077_v21  ;;  %v1083_v22 = vshll.u32 %v1562_v51, %v1077_v21 }
 0x17a   : > { %v2081_v24 = vshrl.u32 %v815_v28, 30  ;;  %v1081_v7 = vshrl.u32 %v1562_v51, %v1078_v50  ;;  %v1084_v16 = vshrl.u32 %v1563_v53, %v1078_v50  ;;  %v1086_v5 = vshll.u32 %v1563_v53, %v1077_v21 }
 0x17b   : > { %v2086_v17 = vpop.eup %1468  ;;  %vm447_vm1 = vcmp.lt.s32.totalorder %v1681_v25, 0  ;;  %v1039_v31 = vor.u32 4788187, %v1038_v29  ;;  %v1087_v11 = vshrl.u32 %v1564_v55, %v1078_v50  ;;  %v1089_v44 = vshll.u32 %v1564_v55, %v1077_v21 }
 0x17c   : > { %v1090_v3 = vshrl.u32 %v1565_v57, %v1078_v50  ;;  %v817_v43 = vshll.u32 %v2081_v24, 30  ;;  %v1082_v48 = vor.u32 %v1081_v7, %v1080_v4  ;;  %v1085_v56 = vor.u32 %v1084_v16, %v1083_v22 }
 0x17d   : > { %v2093_v39 = vshll.u32 %v1071_v30, 8  ;;  %v529_v59 = vxor.u32 2147483648, %v528_v63  ;;  %v1035_v33 = vor.u32 %v1034_v23, %v1033_v20  ;;  %v1088_v52 = vor.u32 %v1087_v11, %v1086_v5 }
 0x17e   : > { %v1091_v60 = vor.u32 %v1090_v3, %v1089_v44  ;;  %vm2097_vm3 = vcmp.le.f32.partialorder %v445_v38, 0.7853982  ;;  %v2101_v10 = vsub.s32 %v814_v40, %v817_v43  ;;  %v1092_v28 = vshll.u32 %v1565_v57, %v1077_v21 }
 0x17f   : > { %v1093_v29 = vshrl.u32 %v1566_v0, %v1078_v50  ;;  %v861_v4 = vshrl.u32 %v860_v42, 23  ;;  %v1040_v22 = vand.u32 2147483647, %v1039_v31  ;;  %vm1095_vm4 = vcmp.lt.s32.totalorder %v2077_v6, 1 }
 0x180   : > { %vm1096_vm5 = vcmp.lt.s32.totalorder %v2077_v6, 2  ;;  %vm1097_vm7 = vcmp.lt.s32.totalorder %v2077_v6, 3  ;;  %v820_v30 = vsub.s32 0, %v2101_v10  ;;  %vm1098_vm8 = vcmp.lt.s32.totalorder %v2077_v6, 4 }
 0x181   : > { %v1094_v38 = vor.u32 %v1093_v29, %v1092_v28  ;;  %v1103_v40 = vsel %vm1095_vm4, %v1082_v48, %v1085_v56  ;;  %v1042_v20 = vcvt.s32.f32 %v1035_v33  ;;  %v1079_v21 = vshrl.u32 %v1561_v47, %v1078_v50 }
 0x182   : > { %v1104_v23 = vsel %vm1098_vm8, %v1091_v60, 920167782  ;;  %v1107_v42 = vsel %vm1095_vm4, %v1085_v56, %v1088_v52  ;;  %vm962_vm9 = vcmp.lt.s32.totalorder %v1684_v34, 0  ;;  %v1322_v7 = vmin.u32 %v820_v30, %v2101_v10 }
 0x183   : > { %v1100_v16 = vsel %vm1098_vm8, %v1088_v52, 2102212464  ;;  %v1105_v5 = vsel %vm1097_vm7, %v1088_v52, %v1104_v23  ;;  %v1108_v31 = vsel %vm1098_vm8, %v1094_v38, 1326507024  ;;  %v1043_v11 = vmul.f32 %v1042_v20, %v1040_v22 }
 0x184   : > { %v1106_v44 = vsel %vm1096_vm5, %v1103_v40, %v1105_v5  ;;  %v1109_v50 = vsel %vm1097_vm7, %v1091_v60, %v1108_v31  ;;  %v1325_v3 = vadd.s32 4294967169, %v861_v4  ;;  %v530_v43 = vsel %vm447_vm1, %v529_v59, %v528_v63 }
 0x185   : > { %v822_v33 = vclz %v1322_v7  ;;  %v1099_v28 = vsel %vm1095_vm4, %v1079_v21, %v1082_v48  ;;  %v1110_v29 = vsel %vm1096_vm5, %v1107_v42, %v1109_v50  ;;  %v1101_v52 = vsel %vm1097_vm7, %v1085_v56, %v1100_v16 }
 0x186   : > { %v2132_v22 = vmul.u32.u64.low %v2093_v39, %v1110_v29  ;;  %v2133_v30 = vmul.u32.u64.high %v2093_v39, %v1110_v29, %v2132_v22  ;;  %v867_v38 = vadd.s32 1, %v1325_v3  ;;  %v857_v63 = vand.u32 2147483647, %v1690_v41 }
 0x187   : > { %v1323_v60 = vadd.s32 4294967294, %v822_v33  ;;  %v2136_v4 = vmul.u32.u64.low %v2093_v39, %v1106_v44  ;;  %v2137_v40 = vmul.u32.u64.high %v2093_v39, %v1106_v44, %v2136_v4  ;;  %1470 = vcosq.f32 %v2005_v2 }
 0x188   : > { %v533_v48 = vsel %vm2097_vm3, %v1681_v25, %v530_v43  ;;  %v1044_v56 = vxor.u32 2147483648, %v1043_v11  ;;  %vm868_vm10 = vcmp.gt.s32.totalorder %v867_v38, 0  ;;  %1472 = vcosq.f32 %v2071_v19 }
 0x189   : > { %vm1324_vm11 = vcmp.lt.s32.totalorder %v1323_v60, 0  ;;  %v1102_v59 = vsel %vm1096_vm5, %v1099_v28, %v1101_v52  ;;  %v869_v20 = vsel %vm868_vm10, %v867_v38, 0  ;;  %1474 = vsinq.f32 %v2071_v19 }
 0x18a   : > { %v2154_v2 = vsel %vm447_vm1, %v531_v46, %v1912_v45  ;;  %vm2158_vm12 = vcmp.le.f32.partialorder %v960_v61, 0.7853982  ;;  %vm1120_vm13 = vc.u32 %v2133_v30, %v2136_v4  ;;  %1476 = vcosq.f32 %v533_v48 }
 0x18b   : > { %v1046_v6 = vsub.s32 4, %v2017_v32  ;;  %v1121_v19 = vadd.s32 1, %v2137_v40  ;;  %v864_v23 = vand.u32 8388607, %v857_v63  ;;  %v1045_v45 = vsel %vm962_vm9, %v1044_v56, %v1043_v11 }
 0x18c   : > { %v2170_v46 = vsel %vm1324_vm11, 0, %v1323_v60  ;;  %v1118_v61 = vmul.u32 %v2093_v39, %v1102_v59  ;;  %v871_v42 = vand.u32 31, %v869_v20  ;;  %1478 = vsinq.f32 %v533_v48 }
 0x18d   : > { %v1122_v7 = vsel %vm1120_vm13, %v1121_v19, %v2137_v40  ;;  %v431_v16 = vsel %vm1943_vm6, 0, %v1995_v36  ;;  %v438_v5 = vxor.u32 2147483648, %v2086_v17  ;;  %v2180_v31 = vadd.s32 %v2046_v1, %v2053_v13 }
 0x18e   : > { %v1123_v44 = vadd.s32 %v1122_v7, %v1118_v61  ;;  %v870_v11 = vshrl.u32 %v869_v20, 5  ;;  %v872_v50 = vsub.s32 32, %v871_v42  ;;  %v2185_v39 = vsel %vm2158_vm12, %v1684_v34, %v1045_v45 }
 0x18f   : > { %v830_v3 = vsub.s32 4294967266, %v2170_v46  ;;  %v865_v43 = vor.u32 8388608, %v864_v23  ;;  %v874_v49 = vshll.u32 %v1561_v47, %v871_v42  ;;  %v877_v28 = vshll.u32 %v1562_v51, %v871_v42 }
 0x190   : > { %v1124_v36 = vadd.s32 536870912, %v1123_v44  ;;  %v875_v33 = vshrl.u32 %v1562_v51, %v872_v50  ;;  %v878_v1 = vshrl.u32 %v1563_v53, %v872_v50  ;;  %v880_v13 = vshll.u32 %v1563_v53, %v871_v42 }
 0x191   : > { %v881_v29 = vshrl.u32 %v1564_v55, %v872_v50  ;;  %v883_v52 = vshll.u32 %v1564_v55, %v871_v42  ;;  %v884_v22 = vshrl.u32 %v1565_v57, %v872_v50  ;;  %v1471_v38 = vpop.eup %1470  ;;  %vm889_vm6 = vcmp.lt.s32.totalorder %v870_v11, 1 }
 0x192   : > { %v2196_v60 = vshrl.u32 %v1124_v36, 30  ;;  %v876_v40 = vor.u32 %v875_v33, %v874_v49  ;;  %v879_v48 = vor.u32 %v878_v1, %v877_v28  ;;  %v2198_v56 = vpop.eup %1472  ;;  %v886_v20 = vshll.u32 %v1565_v57, %v871_v42 }
 0x193   : > { %v882_v59 = vor.u32 %v881_v29, %v880_v13  ;;  %v885_v51 = vor.u32 %v884_v22, %v883_v52  ;;  %v887_v53 = vshrl.u32 %v1566_v0, %v872_v50  ;;  %v2202_v19 = vpop.eup %1474  ;;  %vm892_vm14 = vcmp.lt.s32.totalorder %v870_v11, 4 }
 0x194   : > { %v1126_v55 = vshll.u32 %v2196_v60, 30  ;;  %v897_v23 = vsel %vm889_vm6, %v876_v40, %v879_v48  ;;  %v905_v45 = vshll.u32 %v865_v43, 8  ;;  %v1477_v61 = vpop.eup %1476  ;;  %vm890_vm15 = vcmp.lt.s32.totalorder %v870_v11, 2 }
 0x195   : > { %v888_v7 = vor.u32 %v887_v53, %v886_v20  ;;  %vm891_vm0 = vcmp.lt.s32.totalorder %v870_v11, 3  ;;  %v898_v49 = vsel %vm892_vm14, %v885_v51, 920167782  ;;  %v873_v57 = vshrl.u32 %v1561_v47, %v872_v50 }
 0x196   : > { %v2207_v36 = vsub.s32 %v1123_v44, %v1126_v55  ;;  %v894_v0 = vsel %vm892_vm14, %v882_v59, 2102212464  ;;  %v899_v42 = vsel %vm891_vm0, %v882_v59, %v898_v49  ;;  %v1479_v33 = vpop.eup %1478  ;;  %v831_v28 = vadd.s32 127, %v830_v3 }
 0x197   : > { %v900_v1 = vsel %vm890_vm15, %v897_v23, %v899_v42  ;;  %v435_v13 = vand.u32 3, %v431_v16  ;;  %v441_v43 = vxor.u32 2147483648, %v1471_v38  ;;  %v893_v52 = vsel %vm889_vm6, %v873_v57, %v876_v40 }
 0x198   : > { %v1129_v29 = vsub.s32 0, %v2207_v36  ;;  %v901_v22 = vsel %vm889_vm6, %v879_v48, %v882_v59  ;;  %v902_v44 = vsel %vm892_vm14, %v888_v7, 1326507024  ;;  %v895_v47 = vsel %vm891_vm0, %v879_v48, %v894_v0 }
 0x199   : > { %v903_v50 = vsel %vm891_vm0, %v885_v51, %v902_v44  ;;  %v2219_v20 = vmul.u32.u64.low %v905_v45, %v900_v1  ;;  %v2220_v53 = vmul.u32.u64.high %v905_v45, %v900_v1, %v2219_v20  ;;  %vm434_vm2 = vweird.f32 %v1670_v15 }
 0x19a   : > { %v1334_v3 = vmin.u32 %v1129_v29, %v2207_v36  ;;  %v904_v16 = vsel %vm890_vm15, %v901_v22, %v903_v50  ;;  %v534_v40 = vsel %vm2097_vm3, 0, %v2154_v2  ;;  %vm537_vm1 = vweird.f32 %v1681_v25 }
 0x19b   : > { %v826_v48 = vsub.s32 32, %v2170_v46  ;;  %v832_v59 = vshll.u32 %v831_v28, 23  ;;  %v2231_v51 = vmul.u32.u64.low %v905_v45, %v904_v16  ;;  %v2232_v55 = vmul.u32.u64.high %v905_v45, %v904_v16, %v2231_v51 }
 0x19c   : > { %v1131_v23 = vclz %v1334_v3  ;;  %v896_v7 = vsel %vm890_vm15, %v893_v52, %v895_v47  ;;  %vm437_vm4 = vcmp.eq.s32.totalorder %v435_v13, 0  ;;  %vm440_vm5 = vcmp.eq.s32.totalorder %v435_v13, 2 }
 0x19d   : > { %v915_v49 = vadd.s32 1, %v2220_v53  ;;  %v439_v57 = vsel %vm437_vm4, %v1471_v38, %v438_v5  ;;  %v442_v62 = vsel %vm440_vm5, %v441_v43, %v2086_v17  ;;  %v538_v2 = vand.u32 3, %v534_v40 }
 0x19e   : > { %v1335_v0 = vadd.s32 4294967294, %v1131_v23  ;;  %vm436_vm3 = vcmp.lt.s32.totalorder %v435_v13, 2  ;;  %v541_v42 = vxor.u32 2147483648, %v1479_v33  ;;  %v544_v28 = vxor.u32 2147483648, %v1477_v61 }
 0x19f   : > { %v912_v1 = vmul.u32 %v905_v45, %v896_v7  ;;  %vm914_vm7 = vc.u32 %v2232_v55, %v2219_v20  ;;  %v443_v11 = vsel %vm436_vm3, %v439_v57, %v442_v62  ;;  %vm539_vm8 = vcmp.lt.s32.totalorder %v538_v2, 2 }
 0x1a0   : > { %vm1336_vm10 = vcmp.lt.s32.totalorder %v1335_v0, 0  ;;  %v916_v29 = vsel %vm914_vm7, %v915_v49, %v2220_v53  ;;  %vm540_vm11 = vcmp.eq.s32.totalorder %v538_v2, 0  ;;  %vm543_vm13 = vcmp.eq.s32.totalorder %v538_v2, 2 }
 0x1a1   : > { %v1134_v52 = vsel %vm1336_vm10, 0, %v1335_v0  ;;  %v917_v5 = vadd.s32 %v916_v29, %v912_v1  ;;  %v542_v38 = vsel %vm540_vm11, %v1477_v61, %v541_v42  ;;  %v545_v17 = vsel %vm543_vm13, %v544_v28, %v1479_v33 }
 0x1a2   : > { %v1119_v13 = vadd.s32 %v2136_v4, %v2133_v30  ;;  %v1135_v43 = vsub.s32 32, %v1134_v52  ;;  %v1139_v22 = vsub.s32 4294967266, %v1134_v52  ;;  %v546_v45 = vsel %vm539_vm8, %v542_v38, %v545_v17 }
 0x1a3   : > { %v828_v44 = vshrl.u32 %v2180_v31, %v826_v48  ;;  %v918_v47 = vadd.s32 536870912, %v917_v5  ;;  %v444_v50 = vsel %vm434_vm2, nan, %v443_v11  ;;  %v547_v53 = vsel %vm537_vm1, nan, %v546_v45 }
 0x1a4   : > { %v1136_v3 = vshll.u32 %v2207_v36, %v1134_v52  ;;  %v1137_v16 = vshrl.u32 %v1119_v13, %v1135_v43  ;;  %v1140_v61 = vadd.s32 127, %v1139_v22  ;;  %v1167_v33 = vpack.c.bf16 %v547_v53, %v444_v50 }
 0x1a5   : > { %v833_v40 = vor.u32 4788187, %v832_v59  ;;  %v2250_v51 = vshrl.u32 %v918_v47, 30  ;;  %v644_v30 = vxor.u32 2147483648, %v2036_v54  ;;  %v647_v4 = vxor.u32 2147483648, %v2034_v26 }
 0x1a6   : > { %1480 = vcosq.f32 %v2185_v39  ;;  %v827_v15 = vshll.u32 %v2101_v10, %v2170_v46  ;;  %v1138_v31 = vor.u32 %v1137_v16, %v1136_v3  ;;  %v1141_v25 = vshll.u32 %v1140_v61, 23  ;;  %1365 = vmatpush3.bf16.msra.mxu1 %v1167_v33 }
 0x1a7   : > { %1482 = vsinq.f32 %v2185_v39  ;;  %vm1065_vm6 = vcmp.lt.s32.totalorder %v1688_v37, 0  ;;  %v920_v36 = vshll.u32 %v2250_v51, 30  ;;  %1366 = vmatprep.subr.bf16.mxu1 %v1567_v58  ;;  %vm643_vm14 = vcmp.eq.s32.totalorder %v1902_v14, 0 }
 0x1a8   : > { %vm646_vm15 = vcmp.eq.s32.totalorder %v1902_v14, 2  ;;  %v829_v48 = vor.u32 %v828_v44, %v827_v15  ;;  %v1142_v59 = vor.u32 4788187, %v1141_v25  ;;  %v645_v23 = vsel %vm643_vm14, %v2034_v26, %v644_v30 }
 0x1a9   : > { %v648_v10 = vsel %vm646_vm15, %v647_v4, %v2036_v54  ;;  %v834_v46 = vand.u32 2147483647, %v833_v40  ;;  %v921_v7 = vsub.s32 %v917_v5, %v920_v36  ;;  %vm642_vm0 = vcmp.lt.s32.totalorder %v1902_v14, 2 }
 0x1aa   : > { %v747_v39 = vxor.u32 2147483648, %v2202_v19  ;;  %v1143_v49 = vand.u32 2147483647, %v1142_v59  ;;  %v1145_v57 = vcvt.s32.f32 %v1138_v31  ;;  %vm746_vm2 = vcmp.eq.s32.totalorder %v2050_v8, 0 }
 0x1ab   : > { %v750_v62 = vxor.u32 2147483648, %v2198_v56  ;;  %v923_v2 = vsub.s32 0, %v921_v7  ;;  %v649_v0 = vsel %vm642_vm0, %v645_v23, %v648_v10  ;;  %vm749_vm1 = vcmp.eq.s32.totalorder %v2050_v8, 2 }
 0x1ac   : > { %v748_v42 = vsel %vm746_vm2, %v2198_v56, %v747_v39  ;;  %v836_v26 = vcvt.s32.f32 %v829_v48  ;;  %v1146_v54 = vmul.f32 %v1145_v57, %v1143_v49  ;;  %vm745_vm4 = vcmp.lt.s32.totalorder %v2050_v8, 2 }
 0x1ad   : > { %v751_v14 = vsel %vm749_vm1, %v750_v62, %v2202_v19  ;;  %v1326_v28 = vmin.u32 %v923_v2, %v921_v7  ;;  %vm640_vm5 = vweird.f32 %v1666_v12  ;;  %vm743_vm3 = vweird.f32 %v1674_v18 }
 0x1ae   : > { %v752_v1 = vsel %vm745_vm4, %v748_v42, %v751_v14  ;;  %v1047_v56 = vsel %vm962_vm9, %v1046_v6, %v2017_v32  ;;  %v1147_v11 = vxor.u32 2147483648, %v1146_v54  ;;  %v650_v29 = vsel %vm640_vm5, nan, %v649_v0 }
 0x1af   : > { %v753_v52 = vsel %vm743_vm3, nan, %v752_v1  ;;  %v837_v5 = vmul.f32 %v836_v26, %v834_v46  ;;  %v1149_v8 = vsub.s32 4, %v2196_v60  ;;  %v925_v38 = vclz %v1326_v28 }
 0x1b0   : > { %v1168_v19 = vpack.c.bf16 %v753_v52, %v650_v29  ;;  %v1481_v17 = vpop.eup %1480  ;;  %vm2283_vm7 = vcmp.le.f32.partialorder %v1063_v9, 0.7853982  ;;  %v1148_v18 = vsel %vm1065_vm6, %v1147_v11, %v1146_v54  ;;  %v1049_v43 = vsel %vm2158_vm12, 0, %v1047_v56 }
 0x1b1   : > { %v1483_v13 = vpop.eup %1482  ;;  %v1151_v32 = vsel %vm2283_vm7, %v1688_v37, %v1148_v18  ;;  %v1327_v6 = vadd.s32 4294967294, %v925_v38  ;;  %v838_v9 = vxor.u32 2147483648, %v837_v5  ;;  %v1150_v22 = vsel %vm1065_vm6, %v1149_v8, %v2196_v60 }
 0x1b2   : > { %1367 = vmatpush3.bf16.msra.mxu1 %v1168_v19  ;;  %1484 = vcosq.f32 %v1151_v32  ;;  %v913_v44 = vadd.s32 %v2219_v20, %v2232_v55  ;;  %v1053_v53 = vand.u32 3, %v1049_v43  ;;  %vm756_vm8 = vcmp.lt.s32.totalorder %v1686_v35, 0 }
 0x1b3   : > { %1368 = vmatprep.subr.bf16.mxu1 %v1567_v58  ;;  %1486 = vsinq.f32 %v1151_v32  ;;  %vm1328_vm9 = vcmp.lt.s32.totalorder %v1327_v6, 0  ;;  %v1152_v21 = vsel %vm2283_vm7, 0, %v1150_v22  ;;  %v839_v3 = vsel %vm756_vm8, %v838_v9, %v837_v5 }
 0x1b4   : > { %v928_v45 = vsel %vm1328_vm9, 0, %v1327_v6  ;;  %vm1568_vm12 = vmmov 0   ;;  %v1056_v33 = vxor.u32 2147483648, %v1483_v13  ;;  %v1059_v40 = vxor.u32 2147483648, %v1481_v17 }
 0x1b5   : > { %v929_v47 = vsub.s32 32, %v928_v45  ;;  %v933_v50 = vsub.s32 4294967266, %v928_v45  ;;  %v930_v16 = vshll.u32 %v921_v7, %v928_v45  ;;  %1372 = vmatprep.mubr.msk.bf16.mxu1 %vm1568_vm12, %v1567_v58  ;;  %vm2308_vm10 = vcmp.le.f32.partialorder %v754_v27, 0.7853982 }
 0x1b6   : > { %v842_v4 = vsel %vm2308_vm10, %v1686_v35, %v839_v3  ;;  %v1156_v15 = vand.u32 3, %v1152_v21  ;;  %vm1055_vm11 = vcmp.eq.s32.totalorder %v1053_v53, 0  ;;  %vm1058_vm13 = vcmp.eq.s32.totalorder %v1053_v53, 2 }
 0x1b7   : > { %v931_v61 = vshrl.u32 %v913_v44, %v929_v47  ;;  %v934_v60 = vadd.s32 127, %v933_v50  ;;  %v1057_v36 = vsel %vm1055_vm11, %v1481_v17, %v1056_v33  ;;  %v1060_v48 = vsel %vm1058_vm13, %v1059_v40, %v1483_v13  ;;  %v1166_v47 = vld [vmem:[%s2395_s2] sm:$0x1] }
 0x1b8   : > { %1488 = vcosq.f32 %v842_v4  ;;  %vm1054_vm6 = vcmp.lt.s32.totalorder %v1053_v53, 2  ;;  %vm1161_vm14 = vcmp.eq.s32.totalorder %v1156_v15, 2  ;;  %vm1158_vm15 = vcmp.eq.s32.totalorder %v1156_v15, 0 }
 0x1b9   : > { %v932_v55 = vor.u32 %v931_v61, %v930_v16  ;;  %v935_v30 = vshll.u32 %v934_v60, 23  ;;  %1490 = vsinq.f32 %v842_v4  ;;  %v1061_v39 = vsel %vm1054_vm6, %v1057_v36, %v1060_v48 }
 0x1ba   : > { %v840_v57 = vsub.s32 4, %v2081_v24  ;;  %vm1157_vm0 = vcmp.lt.s32.totalorder %v1156_v15, 2  ;;  %vm1052_vm2 = vweird.f32 %v1684_v34  ;;  %vm1155_vm1 = vweird.f32 %v1688_v37 }
 0x1bb   : > { %v936_v31 = vor.u32 4788187, %v935_v30  ;;  %v939_v27 = vcvt.s32.f32 %v932_v55  ;;  %vm859_vm4 = vcmp.lt.s32.totalorder %v1690_v41, 0  ;;  %v1062_v42 = vsel %vm1052_vm2, nan, %v1061_v39 }
 0x1bc   : > { %v1485_v25 = vpop.eup %1484  ;;  %vm2321_vm5 = vcmp.le.f32.partialorder %v857_v63, 0.7853982  ;;  %v943_v28 = vsub.s32 4, %v2250_v51  ;;  %v841_v34 = vsel %vm756_vm8, %v840_v57, %v2081_v24  ;;  %vm949_vm11 = vweird.f32 %v1690_v41 }
 0x1bd   : > { %v1487_v59 = vpop.eup %1486  ;;  %v937_v23 = vand.u32 2147483647, %v936_v31  ;;  %v1162_v10 = vxor.u32 2147483648, %v1485_v25  ;;  %v843_v63 = vsel %vm2308_vm10, 0, %v841_v34  ;;  %vm846_vm13 = vweird.f32 %v1686_v35 }
 0x1be   : > { %v1159_v46 = vxor.u32 2147483648, %v1487_v59  ;;  %v944_v11 = vsel %vm859_vm4, %v943_v28, %v2250_v51  ;;  %v847_v52 = vand.u32 3, %v843_v63  ;;  %vm1171_vm6 = vcmask 523264  }
 0x1bf   : > { %v940_v7 = vmul.f32 %v939_v27, %v937_v23  ;;  %v1163_v49 = vsel %vm1161_vm14, %v1162_v10, %v1487_v59  ;;  %v946_v5 = vsel %vm2321_vm5, 0, %v944_v11 }
 0x1c0   : > { %v1160_v62 = vsel %vm1158_vm15, %v1485_v25, %v1159_v46  ;;  %v950_v24 = vand.u32 3, %v946_v5  ;;  %vm849_vm3 = vcmp.eq.s32.totalorder %v847_v52, 0  ;;  %vm852_vm7 = vcmp.eq.s32.totalorder %v847_v52, 2 }
 0x1c1   : > { %v941_v2 = vxor.u32 2147483648, %v940_v7  ;;  %v1164_v0 = vsel %vm1157_vm0, %v1160_v62, %v1163_v49  ;;  %vm848_vm9 = vcmp.lt.s32.totalorder %v847_v52, 2 }
 0x1c2   : > { %v1165_v26 = vsel %vm1155_vm1, nan, %v1164_v0  ;;  %v1489_v56 = vpop.eup %1488  ;;  %vm955_vm8 = vcmp.eq.s32.totalorder %v950_v24, 2  ;;  %vm952_vm12 = vcmp.eq.s32.totalorder %v950_v24, 0  ;;  %vm951_vm10 = vcmp.lt.s32.totalorder %v950_v24, 2 }
 0x1c3   : > { %v942_v14 = vsel %vm859_vm4, %v941_v2, %v940_v7  ;;  %v1170_v1 = vpack.c.bf16 %v1165_v26, %v1062_v42  ;;  %v1491_v29 = vpop.eup %1490  ;;  %v853_v38 = vxor.u32 2147483648, %v1489_v56 }
 0x1c4   : > { %v945_v37 = vsel %vm2321_vm5, %v1690_v41, %v942_v14  ;;  %v850_v8 = vxor.u32 2147483648, %v1491_v29 }
 0x1c5   : > { %1492 = vcosq.f32 %v945_v37  ;;  %v854_v12 = vsel %vm852_vm7, %v853_v38, %v1491_v29 }
 0x1c6   : > { %1494 = vsinq.f32 %v945_v37  ;;  %v851_v17 = vsel %vm849_vm3, %v1489_v56, %v850_v8 }
 0x1c7   : > { %v855_v6 = vsel %vm848_vm9, %v851_v17, %v854_v12 }
 0x1c8   : > { %v856_v22 = vsel %vm846_vm13, nan, %v855_v6 }
 0x1cf   : > { %v1493_v19 = vpop.eup %1492 }
 0x1d0   : > { %v1495_v18 = vpop.eup %1494  ;;  %v956_v13 = vxor.u32 2147483648, %v1493_v19 }
 0x1d1   : > { %v953_v32 = vxor.u32 2147483648, %v1495_v18 }
 0x1d2   : > { %v957_v51 = vsel %vm955_vm8, %v956_v13, %v1495_v18 }
 0x1d3   : > { %v954_v43 = vsel %vm952_vm12, %v1493_v19, %v953_v32 }
 0x1d4   : > { %v958_v9 = vsel %vm951_vm10, %v954_v43, %v957_v51 }
 0x1d5   : > { %v959_v45 = vsel %vm949_vm11, nan, %v958_v9 }
 0x1d6   : > { %v1169_v44 = vpack.c.bf16 %v959_v45, %v856_v22 }
 0x1d8   : > { %1369 = vmatpush3.bf16.msra.mxu1 %v1169_v44 }
 0x1d9   : > { %1370 = vmatprep.subr.bf16.mxu1 %v1567_v58 }
 0x1dc   : > { %1371 = vmatpush3.bf16.msra.mxu1 %v1170_v1 }
 0x1df   : > { %1373 = vmatmul.mubr.msk.bf16.vlgmr.msra.gmra.mrb[0].mxu1 %vm1171_vm6, %v1166_v47 }
 0x2b2   : > { %v1209_v35 = vpop.f32.mrb[0].mxu1 }
 0x2b3   : > { %1215 = vst [vmem:[%s216_s26] sm:$0x1] %v1209_v35  ;;  %v1374_v41 = vpop.f32.mrb[1].mxu1 }
 0x2b4   : > { %v1212_v58 = vpop.f32.mrb[2].mxu1 }
 0x2b5   : > { %1509 = shalt.err (!%p1506_p5)
}
 0x2b6   : > { %s1510_s4 = scalar_lea.hbm %s2351_s5, 16  ;;  %s1514_s17 = scalar_lea.hbm %s2396_s3, 32 }
 0x2b7   : > { %p1511_p7 = scmp.ne.s32.totalorder %s2351_s5, %s1510_s4  ;;  %p1515_p12 = scmp.lt.u32.totalorder %s2351_s5, %s2396_s3 }
 0x2b8   : > { %p1516_p13 = scmp.lt.u32.totalorder %s1514_s17, %s1510_s4  ;;  %p1518_p1 = scmp.lt.u32.totalorder %s1510_s4, %s2351_s5 }
 0x2b9   : > { %p1512_p10 = pnand %p1511_p7, %p1628_p6 }
 0x2ba   : > { %p1517_p0 = por %p1516_p13, %p1515_p12 }
 0x2bb   : > { %p1513_p11 = pneg %p1512_p10 }
 0x2bc   : > { %p1519_p2 = por %p1518_p1, %p1517_p0 }
 0x2be   : > { %p1520_p3 = pnand %p1519_p2, %p1513_p11 }
 0x2c0   : > { %1523 = shalt.err (!%p1520_p3)
}
 0x2c1   : > { %1410 = dma.vmem_to_hbm [thread:$0]  (%p1628_p6), %s2346_s27, 16, %s2351_s5, %s1217_s6   ;;  %v1375_v50 = vpop.f32.mrb[3].mxu1 }
 0x2c2 PF: > { %s1241_s24 = sand.u32 1, %s1546_s12   ;;  %p1413_p4 = pnand %p1292_p9, %p1632_p8 }
 0x2c3   : > { %s1242_s25 = scalar_lea.sflag [#allocation4], %s1241_s24 }
 0x2c4   : > { %1541 = dma.done.wait (!%p1413_p4), %s1242_s25, 16  }
 0x2c5   : > { %1543 = vsyncadd (!%p1413_p4), %s1242_s25, 4294967280  ;;  %p13_p5 = scmp.ge.s32.totalorder %s1613_s18, 4   ;;  %s2415_s12 = smov %s1550_s13 }
 0x2c6   : > { %s2416_s13 = smov %s1554_s14  ;;  %s2417_s14 = smov %s1626_s21 }
 0x2c7   : > { %s2418_s15 = smov %s1613_s18  ;;  %15 = sbr.rel (!%p13_p5) target bundleno = 3 (0x3), region = 113 }
 0x2ce   :  { %1246 = vsyncpa [#allocation4], 1 }
 0x2cf   :  { %1248 = vsyncpa [#allocation4 + $0x1], 1 }

</bundles_post_ra>
